<compile_context>
chip_gen: v7x
topology: tpu7x:2x2x1
jax: 0.10.0
libtpu: 0.0.40
codegen_flags: <defaults>
</compile_context>

<pallas_src>
import functools
import math

import jax
import jax.numpy as jnp
import numpy as np
from jax.experimental import pallas as pl
from jax.experimental.pallas import tpu as pltpu  # noqa: F401  (TPU backend)

EPS = 1e-5  # nn.LayerNorm default


def _layer_norm(x, g, b):
    mu = jnp.mean(x, axis=-1, keepdims=True)
    var = jnp.mean((x - mu) ** 2, axis=-1, keepdims=True)
    return (x - mu) * jax.lax.rsqrt(var + EPS) * g + b


def _gelu_exact(x):
    # nn.GELU default = exact erf formulation
    return 0.5 * x * (1.0 + jax.lax.erf(x * (1.0 / math.sqrt(2.0))))


# ----------------------------------------------------------------------------
# Single fused kernel: embed -> cls prepend -> depth x (MHSA + MLP) -> LayerNorm
# ----------------------------------------------------------------------------
def fused_vit_kernel(*refs, B, N, depth, num_heads, head_dim, scale):
    # refs = [x2d, embed_w, embed_b, cls2d, attn_bias,
    #         (11 params per block) * depth, norm_g, norm_b, out]
    x_ref, ew_ref, eb_ref, cls_ref, bias_ref = refs[0:5]
    rest = refs[5:]
    block_refs = [rest[11 * d: 11 * (d + 1)] for d in range(depth)]
    ng_ref = rest[11 * depth]
    nb_ref = rest[11 * depth + 1]
    o_ref = rest[11 * depth + 2]

    T = N + 1
    BT = B * T
    D = ew_ref.shape[1]
    H = num_heads
    hd = head_dim

    # ---- linear_embed_msa: (B*N, F) @ (F, D) + b -------------------------
    emb = jnp.dot(x_ref[...], ew_ref[...],
                  preferred_element_type=jnp.float32) + eb_ref[...]   # (B*N, D)

    # ---- prepend cls token per batch -> flattened (B*T, D) ----------------
    cls = cls_ref[...]                                                # (1, D)
    pieces = []
    for b in range(B):
        pieces.append(cls)
        pieces.append(emb[b * N:(b + 1) * N, :])
    x = jnp.concatenate(pieces, axis=0)                               # (BT, D)

    bias = bias_ref[...]                                              # (H*BT, H*BT)

    # ---- transformer blocks ----------------------------------------------
    for d in range(depth):
        (ln1g, ln1b, wqkv, wproj, bproj,
         ln2g, ln2b, w1, b1, w2, b2) = block_refs[d]

        # --- MHSA branch ---
        xn = _layer_norm(x, ln1g[...], ln1b[...])
        qkv = jnp.dot(xn, wqkv[...],
                      preferred_element_type=jnp.float32)             # (BT, 3D)
        q = qkv[:, 0:D] * scale                                       # scale once
        k = qkv[:, D:2 * D]
        v = qkv[:, 2 * D:3 * D]

        # stack heads along rows: row = (head*B + batch)*T + t
        q_all = jnp.concatenate([q[:, h * hd:(h + 1) * hd] for h in range(H)], 0)
        k_all = jnp.concatenate([k[:, h * hd:(h + 1) * hd] for h in range(H)], 0)
        v_all = jnp.concatenate([v[:, h * hd:(h + 1) * hd] for h in range(H)], 0)

        # one big score matmul; block-diagonal additive mask kills cross
        # (batch, head) terms -> exactly per-(b,h) softmax attention
        s = jax.lax.dot_general(q_all, k_all, (((1,), (1,)), ((), ())),
                                preferred_element_type=jnp.float32) + bias
        s = s - jnp.max(s, axis=-1, keepdims=True)
        p = jnp.exp(s)
        p = p * pl.reciprocal(jnp.sum(p, axis=-1, keepdims=True), approx=True)
        o_all = jnp.dot(p, v_all,
                        preferred_element_type=jnp.float32)           # (H*BT, hd)

        # concat heads back along features -> ONE projection matmul
        attn = jnp.concatenate(
            [o_all[h * BT:(h + 1) * BT, :] for h in range(H)], axis=1)  # (BT, D)
        attn = jnp.dot(attn, wproj[...],
                       preferred_element_type=jnp.float32) + bproj[...]
        x = x + attn

        # --- MLP branch ---
        xn2 = _layer_norm(x, ln2g[...], ln2b[...])
        hid = _gelu_exact(
            jnp.dot(xn2, w1[...], preferred_element_type=jnp.float32) + b1[...])
        x = x + jnp.dot(hid, w2[...],
                        preferred_element_type=jnp.float32) + b2[...]

    # ---- final LayerNorm, single lane-consolidated store -------------------
    o_ref[...] = _layer_norm(x, ng_ref[...], nb_ref[...]).astype(o_ref.dtype)


def vit_encoder_msa_forward(x, params, num_heads):
    B, N, F = x.shape
    D = params["embed_w"].shape[1]
    T = N + 1
    depth = len(params["blocks"])
    head_dim = D // num_heads
    scale = head_dim ** (-0.5)
    BT = B * T
    S = num_heads * BT

    # static block-diagonal additive mask over (head, batch) groups of size T
    gid = np.arange(S) // T
    attn_bias = jnp.asarray(
        np.where(gid[:, None] == gid[None, :], 0.0, -1e30).astype(np.float32))

    order = ("ln1_g", "ln1_b", "wqkv", "wproj", "bproj",
             "ln2_g", "ln2_b", "w1", "b1", "w2", "b2")
    block_args = []
    for bp in params["blocks"]:
        block_args += [bp[k] for k in order]

    kern = functools.partial(fused_vit_kernel, B=B, N=N, depth=depth,
                             num_heads=num_heads, head_dim=head_dim, scale=scale)

    out2d = pl.pallas_call(
        kern,
        out_shape=jax.ShapeDtypeStruct((BT, D), jnp.float32),
    )(x.reshape(B * N, F),
      params["embed_w"], params["embed_b"],
      params["cls_token"].reshape(1, D),
      attn_bias,
      *block_args,
      params["norm_g"], params["norm_b"])

    return out2d.reshape(B, T, D)


# ----------------------------------------------------------------------------
# Deterministic parameter construction (xavier_uniform Linear weights, zero
# biases, LayerNorm = (1, 0), cls_token ~ trunc_normal(std=0.02)).
# Linear weights are stored already transposed to (in, out) for x @ W.
# ----------------------------------------------------------------------------
def xavier_uniform(key, in_dim, out_dim):
    bound = math.sqrt(6.0 / (in_dim + out_dim))
    return jax.random.uniform(key, (in_dim, out_dim), jnp.float32, -bound, bound)


def make_params(key, embed_dim, depth, mlp_ratio, in_feat=35):
    hidden = int(embed_dim * mlp_ratio)
    keys = jax.random.split(key, 2 + 4 * depth)
    params = {
        "embed_w": xavier_uniform(keys[0], in_feat, embed_dim),
        "embed_b": jnp.zeros((1, embed_dim), jnp.float32),
        "cls_token": 0.02 * jax.random.truncated_normal(
            keys[1], -2.0, 2.0, (1, 1, embed_dim), jnp.float32),
        "norm_g": jnp.full((1, embed_dim), 1.0, jnp.float32),
        "norm_b": jnp.zeros((1, embed_dim), jnp.float32),
        "blocks": [],
    }
    for i in range(depth):
        k0, k1, k2, k3 = keys[2 + 4 * i: 2 + 4 * (i + 1)]
        params["blocks"].append({
            "ln1_g": jnp.full((1, embed_dim), 1.0, jnp.float32),
            "ln1_b": jnp.zeros((1, embed_dim), jnp.float32),
            # qkv: bias is NOT used in the PyTorch forward when qkv_bias=False
            "wqkv": xavier_uniform(k0, embed_dim, 3 * embed_dim),
            "wproj": xavier_uniform(k1, embed_dim, embed_dim),
            "bproj": jnp.zeros((1, embed_dim), jnp.float32),
            "ln2_g": jnp.full((1, embed_dim), 1.0, jnp.float32),
            "ln2_b": jnp.zeros((1, embed_dim), jnp.float32),
            "w1": xavier_uniform(k2, embed_dim, hidden),
            "b1": jnp.zeros((1, hidden), jnp.float32),
            "w2": xavier_uniform(k3, hidden, embed_dim),
            "b2": jnp.zeros((1, embed_dim), jnp.float32),
        })
    return params


# ----------------------------------------------------------------------------
# Pure-JAX reference (mirrors the PyTorch forward) for a correctness check.
# ----------------------------------------------------------------------------
def ref_block(x, p, num_heads):
    B, T, D = x.shape
    hd = D // num_heads
    scale = hd ** (-0.5)
    xn = _layer_norm(x, p["ln1_g"], p["ln1_b"])
    qkv = xn @ p["wqkv"]
    q, k, v = jnp.split(qkv, 3, axis=-1)
    q = q.reshape(B, T, num_heads, hd).transpose(0, 2, 1, 3) * scale
    k = k.reshape(B, T, num_heads, hd).transpose(0, 2, 1, 3)
    v = v.reshape(B, T, num_heads, hd).transpose(0, 2, 1, 3)
    a = jax.nn.softmax(jnp.einsum("bhqd,bhkd->bhqk", q, k), axis=-1)
    o = jnp.einsum("bhqk,bhkd->bhqd", a, v).transpose(0, 2, 1, 3).reshape(B, T, D)
    x = x + (o @ p["wproj"] + p["bproj"])
    xn2 = _layer_norm(x, p["ln2_g"], p["ln2_b"])
    x = x + (_gelu_exact(xn2 @ p["w1"] + p["b1"]) @ p["w2"] + p["b2"])
    return x


def ref_forward(x, params, num_heads):
    B = x.shape[0]
    D = params["embed_w"].shape[1]
    h = x @ params["embed_w"] + params["embed_b"]
    cls = jnp.broadcast_to(params["cls_token"], (B, 1, D))
    h = jnp.concatenate([cls, h], axis=1)
    for bp in params["blocks"]:
        h = ref_block(h, bp, num_heads)
    return _layer_norm(h, params["norm_g"], params["norm_b"])


if __name__ == "__main__":
    # Small config consistent with the module's forward ('msa' task):
    B, N, F = 2, 8, 35
    embed_dim, depth, num_heads, mlp_ratio = 32, 2, 4, 4.0

    key = jax.random.PRNGKey(0)
    kx, kp = jax.random.split(key)
    x = jax.random.normal(kx, (B, N, F), jnp.float32)
    params = make_params(kp, embed_dim, depth, mlp_ratio, in_feat=F)

    out = vit_encoder_msa_forward(x, params, num_heads)
    out = jax.block_until_ready(out)

    ref = jax.block_until_ready(ref_forward(x, params, num_heads))
    np.testing.assert_allclose(np.asarray(out), np.asarray(ref),
                               rtol=1e-2, atol=1e-2)
    assert out.shape == (B, N + 1, embed_dim)
    print("KERNEL_OK")
</pallas_src>

<mosaic_0001>
module attributes {stable_mosaic.version = 11 : i64} {
  func.func @fused_vit_kernel(%arg0: memref<16x35xf32, #tpu.memory_space<vmem>>, %arg1: memref<35x32xf32, #tpu.memory_space<vmem>>, %arg2: memref<1x32xf32, #tpu.memory_space<vmem>>, %arg3: memref<1x32xf32, #tpu.memory_space<vmem>>, %arg4: memref<72x72xf32, #tpu.memory_space<vmem>>, %arg5: memref<1x32xf32, #tpu.memory_space<vmem>>, %arg6: memref<1x32xf32, #tpu.memory_space<vmem>>, %arg7: memref<32x96xf32, #tpu.memory_space<vmem>>, %arg8: memref<32x32xf32, #tpu.memory_space<vmem>>, %arg9: memref<1x32xf32, #tpu.memory_space<vmem>>, %arg10: memref<1x32xf32, #tpu.memory_space<vmem>>, %arg11: memref<1x32xf32, #tpu.memory_space<vmem>>, %arg12: memref<32x128xf32, #tpu.memory_space<vmem>>, %arg13: memref<1x128xf32, #tpu.memory_space<vmem>>, %arg14: memref<128x32xf32, #tpu.memory_space<vmem>>, %arg15: memref<1x32xf32, #tpu.memory_space<vmem>>, %arg16: memref<1x32xf32, #tpu.memory_space<vmem>>, %arg17: memref<1x32xf32, #tpu.memory_space<vmem>>, %arg18: memref<32x96xf32, #tpu.memory_space<vmem>>, %arg19: memref<32x32xf32, #tpu.memory_space<vmem>>, %arg20: memref<1x32xf32, #tpu.memory_space<vmem>>, %arg21: memref<1x32xf32, #tpu.memory_space<vmem>>, %arg22: memref<1x32xf32, #tpu.memory_space<vmem>>, %arg23: memref<32x128xf32, #tpu.memory_space<vmem>>, %arg24: memref<1x128xf32, #tpu.memory_space<vmem>>, %arg25: memref<128x32xf32, #tpu.memory_space<vmem>>, %arg26: memref<1x32xf32, #tpu.memory_space<vmem>>, %arg27: memref<1x32xf32, #tpu.memory_space<vmem>>, %arg28: memref<1x32xf32, #tpu.memory_space<vmem>>, %arg29: memref<18x32xf32, #tpu.memory_space<vmem>>) attributes {dimension_semantics = [], scalar_prefetch = 0 : i64, scratch_operands = 0 : i64, tpu.core_type = #tpu.core_type<tc>} {
    %c0 = arith.constant 0 : index
    %c0_0 = arith.constant 0 : index
    %0 = vector.load %arg0[%c0, %c0_0] : memref<16x35xf32, #tpu.memory_space<vmem>>, vector<16x35xf32>
    %c0_1 = arith.constant 0 : index
    %c0_2 = arith.constant 0 : index
    %1 = vector.load %arg1[%c0_1, %c0_2] : memref<35x32xf32, #tpu.memory_space<vmem>>, vector<35x32xf32>
    %cst = arith.constant dense<0.000000e+00> : vector<16x32xf32>
    %2 = tpu.matmul %0, %1, %cst {dimension_numbers = #tpu.dot_dimension_numbers<[1], [0], [0], [1], [0, 0, 1, 1], [], []>} : vector<16x35xf32>, vector<35x32xf32>, vector<16x32xf32> -> vector<16x32xf32>
    %c0_3 = arith.constant 0 : index
    %c0_4 = arith.constant 0 : index
    %3 = vector.load %arg2[%c0_3, %c0_4] : memref<1x32xf32, #tpu.memory_space<vmem>>, vector<1x32xf32>
    %4 = vector.broadcast %3 : vector<1x32xf32> to vector<16x32xf32>
    %5 = arith.addf %2, %4 : vector<16x32xf32>
    %c0_5 = arith.constant 0 : index
    %c0_6 = arith.constant 0 : index
    %6 = vector.load %arg3[%c0_5, %c0_6] : memref<1x32xf32, #tpu.memory_space<vmem>>, vector<1x32xf32>
    %7 = vector.extract_strided_slice %5 {offsets = [0, 0], sizes = [8, 32], strides = [1, 1]} : vector<16x32xf32> to vector<8x32xf32>
    %8 = vector.extract_strided_slice %5 {offsets = [8, 0], sizes = [8, 32], strides = [1, 1]} : vector<16x32xf32> to vector<8x32xf32>
    %9 = tpu.concatenate %6, %7, %6, %8 in 0 : vector<1x32xf32>, vector<8x32xf32>, vector<1x32xf32>, vector<8x32xf32> -> vector<18x32xf32>
    %c0_7 = arith.constant 0 : index
    %c0_8 = arith.constant 0 : index
    %10 = vector.load %arg4[%c0_7, %c0_8] : memref<72x72xf32, #tpu.memory_space<vmem>>, vector<72x72xf32>
    %c0_9 = arith.constant 0 : index
    %c0_10 = arith.constant 0 : index
    %11 = vector.load %arg5[%c0_9, %c0_10] : memref<1x32xf32, #tpu.memory_space<vmem>>, vector<1x32xf32>
    %c0_11 = arith.constant 0 : index
    %c0_12 = arith.constant 0 : index
    %12 = vector.load %arg6[%c0_11, %c0_12] : memref<1x32xf32, #tpu.memory_space<vmem>>, vector<1x32xf32>
    %cst_13 = arith.constant dense<0.000000e+00> : vector<18xf32>
    %13 = vector.multi_reduction <add>, %9, %cst_13 [1] : vector<18x32xf32> to vector<18xf32>
    %14 = vector.shape_cast %13 : vector<18xf32> to vector<18x1xf32>
    %cst_14 = arith.constant 3.200000e+01 : f32
    %15 = vector.broadcast %cst_14 : f32 to vector<18x1xf32>
    %16 = arith.divf %14, %15 : vector<18x1xf32>
    %17 = vector.broadcast %16 : vector<18x1xf32> to vector<18x32xf32>
    %18 = arith.subf %9, %17 : vector<18x32xf32>
    %19 = arith.mulf %18, %18 : vector<18x32xf32>
    %cst_15 = arith.constant dense<0.000000e+00> : vector<18xf32>
    %20 = vector.multi_reduction <add>, %19, %cst_15 [1] : vector<18x32xf32> to vector<18xf32>
    %21 = vector.shape_cast %20 : vector<18xf32> to vector<18x1xf32>
    %cst_16 = arith.constant 3.200000e+01 : f32
    %22 = vector.broadcast %cst_16 : f32 to vector<18x1xf32>
    %23 = arith.divf %21, %22 : vector<18x1xf32>
    %24 = vector.broadcast %16 : vector<18x1xf32> to vector<18x32xf32>
    %25 = arith.subf %9, %24 : vector<18x32xf32>
    %cst_17 = arith.constant 9.99999974E-6 : f32
    %26 = vector.broadcast %cst_17 : f32 to vector<18x1xf32>
    %27 = arith.addf %23, %26 : vector<18x1xf32>
    %28 = math.rsqrt %27 : vector<18x1xf32>
    %29 = vector.broadcast %28 : vector<18x1xf32> to vector<18x32xf32>
    %30 = arith.mulf %25, %29 : vector<18x32xf32>
    %31 = vector.broadcast %11 : vector<1x32xf32> to vector<18x32xf32>
    %32 = arith.mulf %30, %31 : vector<18x32xf32>
    %33 = vector.broadcast %12 : vector<1x32xf32> to vector<18x32xf32>
    %34 = arith.addf %32, %33 : vector<18x32xf32>
    %c0_18 = arith.constant 0 : index
    %c0_19 = arith.constant 0 : index
    %35 = vector.load %arg7[%c0_18, %c0_19] : memref<32x96xf32, #tpu.memory_space<vmem>>, vector<32x96xf32>
    %cst_20 = arith.constant dense<0.000000e+00> : vector<18x96xf32>
    %36 = tpu.matmul %34, %35, %cst_20 {dimension_numbers = #tpu.dot_dimension_numbers<[1], [0], [0], [1], [0, 0, 1, 1], [], []>} : vector<18x32xf32>, vector<32x96xf32>, vector<18x96xf32> -> vector<18x96xf32>
    %37 = vector.extract_strided_slice %36 {offsets = [0, 0], sizes = [18, 32], strides = [1, 1]} : vector<18x96xf32> to vector<18x32xf32>
    %cst_21 = arith.constant 0.353553385 : f32
    %38 = vector.broadcast %cst_21 : f32 to vector<18x32xf32>
    %39 = arith.mulf %37, %38 : vector<18x32xf32>
    %40 = vector.extract_strided_slice %36 {offsets = [0, 32], sizes = [18, 32], strides = [1, 1]} : vector<18x96xf32> to vector<18x32xf32>
    %41 = vector.extract_strided_slice %36 {offsets = [0, 64], sizes = [18, 32], strides = [1, 1]} : vector<18x96xf32> to vector<18x32xf32>
    %42 = vector.extract_strided_slice %39 {offsets = [0, 0], sizes = [18, 8], strides = [1, 1]} : vector<18x32xf32> to vector<18x8xf32>
    %43 = vector.extract_strided_slice %39 {offsets = [0, 8], sizes = [18, 8], strides = [1, 1]} : vector<18x32xf32> to vector<18x8xf32>
    %44 = vector.extract_strided_slice %39 {offsets = [0, 16], sizes = [18, 8], strides = [1, 1]} : vector<18x32xf32> to vector<18x8xf32>
    %45 = vector.extract_strided_slice %39 {offsets = [0, 24], sizes = [18, 8], strides = [1, 1]} : vector<18x32xf32> to vector<18x8xf32>
    %46 = tpu.concatenate %42, %43, %44, %45 in 0 : vector<18x8xf32>, vector<18x8xf32>, vector<18x8xf32>, vector<18x8xf32> -> vector<72x8xf32>
    %47 = vector.extract_strided_slice %40 {offsets = [0, 0], sizes = [18, 8], strides = [1, 1]} : vector<18x32xf32> to vector<18x8xf32>
    %48 = vector.extract_strided_slice %40 {offsets = [0, 8], sizes = [18, 8], strides = [1, 1]} : vector<18x32xf32> to vector<18x8xf32>
    %49 = vector.extract_strided_slice %40 {offsets = [0, 16], sizes = [18, 8], strides = [1, 1]} : vector<18x32xf32> to vector<18x8xf32>
    %50 = vector.extract_strided_slice %40 {offsets = [0, 24], sizes = [18, 8], strides = [1, 1]} : vector<18x32xf32> to vector<18x8xf32>
    %51 = tpu.concatenate %47, %48, %49, %50 in 0 : vector<18x8xf32>, vector<18x8xf32>, vector<18x8xf32>, vector<18x8xf32> -> vector<72x8xf32>
    %52 = vector.extract_strided_slice %41 {offsets = [0, 0], sizes = [18, 8], strides = [1, 1]} : vector<18x32xf32> to vector<18x8xf32>
    %53 = vector.extract_strided_slice %41 {offsets = [0, 8], sizes = [18, 8], strides = [1, 1]} : vector<18x32xf32> to vector<18x8xf32>
    %54 = vector.extract_strided_slice %41 {offsets = [0, 16], sizes = [18, 8], strides = [1, 1]} : vector<18x32xf32> to vector<18x8xf32>
    %55 = vector.extract_strided_slice %41 {offsets = [0, 24], sizes = [18, 8], strides = [1, 1]} : vector<18x32xf32> to vector<18x8xf32>
    %56 = tpu.concatenate %52, %53, %54, %55 in 0 : vector<18x8xf32>, vector<18x8xf32>, vector<18x8xf32>, vector<18x8xf32> -> vector<72x8xf32>
    %cst_22 = arith.constant dense<0.000000e+00> : vector<72x72xf32>
    %57 = tpu.matmul %46, %51, %cst_22 {dimension_numbers = #tpu.dot_dimension_numbers<[1], [1], [0], [0], [0, 0, 1, 0], [], []>} : vector<72x8xf32>, vector<72x8xf32>, vector<72x72xf32> -> vector<72x72xf32>
    %58 = arith.addf %57, %10 : vector<72x72xf32>
    %cst_23 = arith.constant dense<0xFF800000> : vector<72xf32>
    %59 = vector.multi_reduction <maximumf>, %58, %cst_23 [1] : vector<72x72xf32> to vector<72xf32>
    %60 = vector.shape_cast %59 : vector<72xf32> to vector<72x1xf32>
    %61 = vector.broadcast %60 : vector<72x1xf32> to vector<72x72xf32>
    %62 = arith.subf %58, %61 : vector<72x72xf32>
    %63 = math.exp %62 : vector<72x72xf32>
    %cst_24 = arith.constant dense<0.000000e+00> : vector<72xf32>
    %64 = vector.multi_reduction <add>, %63, %cst_24 [1] : vector<72x72xf32> to vector<72xf32>
    %65 = vector.shape_cast %64 : vector<72xf32> to vector<72x1xf32>
    %66 = tpu.reciprocal %65 {approx = true} : vector<72x1xf32> -> vector<72x1xf32>
    %67 = vector.broadcast %66 : vector<72x1xf32> to vector<72x72xf32>
    %68 = arith.mulf %63, %67 : vector<72x72xf32>
    %cst_25 = arith.constant dense<0.000000e+00> : vector<72x8xf32>
    %69 = tpu.matmul %68, %56, %cst_25 {dimension_numbers = #tpu.dot_dimension_numbers<[1], [0], [0], [1], [0, 0, 1, 1], [], []>} : vector<72x72xf32>, vector<72x8xf32>, vector<72x8xf32> -> vector<72x8xf32>
    %70 = vector.extract_strided_slice %69 {offsets = [0, 0], sizes = [18, 8], strides = [1, 1]} : vector<72x8xf32> to vector<18x8xf32>
    %71 = vector.extract_strided_slice %69 {offsets = [18, 0], sizes = [18, 8], strides = [1, 1]} : vector<72x8xf32> to vector<18x8xf32>
    %72 = vector.extract_strided_slice %69 {offsets = [36, 0], sizes = [18, 8], strides = [1, 1]} : vector<72x8xf32> to vector<18x8xf32>
    %73 = vector.extract_strided_slice %69 {offsets = [54, 0], sizes = [18, 8], strides = [1, 1]} : vector<72x8xf32> to vector<18x8xf32>
    %74 = tpu.concatenate %70, %71, %72, %73 in 1 : vector<18x8xf32>, vector<18x8xf32>, vector<18x8xf32>, vector<18x8xf32> -> vector<18x32xf32>
    %c0_26 = arith.constant 0 : index
    %c0_27 = arith.constant 0 : index
    %75 = vector.load %arg8[%c0_26, %c0_27] : memref<32x32xf32, #tpu.memory_space<vmem>>, vector<32x32xf32>
    %cst_28 = arith.constant dense<0.000000e+00> : vector<18x32xf32>
    %76 = tpu.matmul %74, %75, %cst_28 {dimension_numbers = #tpu.dot_dimension_numbers<[1], [0], [0], [1], [0, 0, 1, 1], [], []>} : vector<18x32xf32>, vector<32x32xf32>, vector<18x32xf32> -> vector<18x32xf32>
    %c0_29 = arith.constant 0 : index
    %c0_30 = arith.constant 0 : index
    %77 = vector.load %arg9[%c0_29, %c0_30] : memref<1x32xf32, #tpu.memory_space<vmem>>, vector<1x32xf32>
    %78 = vector.broadcast %77 : vector<1x32xf32> to vector<18x32xf32>
    %79 = arith.addf %76, %78 : vector<18x32xf32>
    %80 = arith.addf %9, %79 : vector<18x32xf32>
    %c0_31 = arith.constant 0 : index
    %c0_32 = arith.constant 0 : index
    %81 = vector.load %arg10[%c0_31, %c0_32] : memref<1x32xf32, #tpu.memory_space<vmem>>, vector<1x32xf32>
    %c0_33 = arith.constant 0 : index
    %c0_34 = arith.constant 0 : index
    %82 = vector.load %arg11[%c0_33, %c0_34] : memref<1x32xf32, #tpu.memory_space<vmem>>, vector<1x32xf32>
    %cst_35 = arith.constant dense<0.000000e+00> : vector<18xf32>
    %83 = vector.multi_reduction <add>, %80, %cst_35 [1] : vector<18x32xf32> to vector<18xf32>
    %84 = vector.shape_cast %83 : vector<18xf32> to vector<18x1xf32>
    %cst_36 = arith.constant 3.200000e+01 : f32
    %85 = vector.broadcast %cst_36 : f32 to vector<18x1xf32>
    %86 = arith.divf %84, %85 : vector<18x1xf32>
    %87 = vector.broadcast %86 : vector<18x1xf32> to vector<18x32xf32>
    %88 = arith.subf %80, %87 : vector<18x32xf32>
    %89 = arith.mulf %88, %88 : vector<18x32xf32>
    %cst_37 = arith.constant dense<0.000000e+00> : vector<18xf32>
    %90 = vector.multi_reduction <add>, %89, %cst_37 [1] : vector<18x32xf32> to vector<18xf32>
    %91 = vector.shape_cast %90 : vector<18xf32> to vector<18x1xf32>
    %cst_38 = arith.constant 3.200000e+01 : f32
    %92 = vector.broadcast %cst_38 : f32 to vector<18x1xf32>
    %93 = arith.divf %91, %92 : vector<18x1xf32>
    %94 = vector.broadcast %86 : vector<18x1xf32> to vector<18x32xf32>
    %95 = arith.subf %80, %94 : vector<18x32xf32>
    %cst_39 = arith.constant 9.99999974E-6 : f32
    %96 = vector.broadcast %cst_39 : f32 to vector<18x1xf32>
    %97 = arith.addf %93, %96 : vector<18x1xf32>
    %98 = math.rsqrt %97 : vector<18x1xf32>
    %99 = vector.broadcast %98 : vector<18x1xf32> to vector<18x32xf32>
    %100 = arith.mulf %95, %99 : vector<18x32xf32>
    %101 = vector.broadcast %81 : vector<1x32xf32> to vector<18x32xf32>
    %102 = arith.mulf %100, %101 : vector<18x32xf32>
    %103 = vector.broadcast %82 : vector<1x32xf32> to vector<18x32xf32>
    %104 = arith.addf %102, %103 : vector<18x32xf32>
    %c0_40 = arith.constant 0 : index
    %c0_41 = arith.constant 0 : index
    %105 = vector.load %arg12[%c0_40, %c0_41] : memref<32x128xf32, #tpu.memory_space<vmem>>, vector<32x128xf32>
    %cst_42 = arith.constant dense<0.000000e+00> : vector<18x128xf32>
    %106 = tpu.matmul %104, %105, %cst_42 {dimension_numbers = #tpu.dot_dimension_numbers<[1], [0], [0], [1], [0, 0, 1, 1], [], []>} : vector<18x32xf32>, vector<32x128xf32>, vector<18x128xf32> -> vector<18x128xf32>
    %c0_43 = arith.constant 0 : index
    %c0_44 = arith.constant 0 : index
    %107 = vector.load %arg13[%c0_43, %c0_44] : memref<1x128xf32, #tpu.memory_space<vmem>>, vector<1x128xf32>
    %108 = vector.broadcast %107 : vector<1x128xf32> to vector<18x128xf32>
    %109 = arith.addf %106, %108 : vector<18x128xf32>
    %cst_45 = arith.constant 5.000000e-01 : f32
    %110 = vector.broadcast %cst_45 : f32 to vector<18x128xf32>
    %111 = arith.mulf %110, %109 : vector<18x128xf32>
    %cst_46 = arith.constant 0.707106769 : f32
    %112 = vector.broadcast %cst_46 : f32 to vector<18x128xf32>
    %113 = arith.mulf %109, %112 : vector<18x128xf32>
    %114 = math.erf %113 : vector<18x128xf32>
    %cst_47 = arith.constant 1.000000e+00 : f32
    %115 = vector.broadcast %cst_47 : f32 to vector<18x128xf32>
    %116 = arith.addf %115, %114 : vector<18x128xf32>
    %117 = arith.mulf %111, %116 : vector<18x128xf32>
    %c0_48 = arith.constant 0 : index
    %c0_49 = arith.constant 0 : index
    %118 = vector.load %arg14[%c0_48, %c0_49] : memref<128x32xf32, #tpu.memory_space<vmem>>, vector<128x32xf32>
    %cst_50 = arith.constant dense<0.000000e+00> : vector<18x32xf32>
    %119 = tpu.matmul %117, %118, %cst_50 {dimension_numbers = #tpu.dot_dimension_numbers<[1], [0], [0], [1], [0, 0, 1, 1], [], []>} : vector<18x128xf32>, vector<128x32xf32>, vector<18x32xf32> -> vector<18x32xf32>
    %120 = arith.addf %80, %119 : vector<18x32xf32>
    %c0_51 = arith.constant 0 : index
    %c0_52 = arith.constant 0 : index
    %121 = vector.load %arg15[%c0_51, %c0_52] : memref<1x32xf32, #tpu.memory_space<vmem>>, vector<1x32xf32>
    %122 = vector.broadcast %121 : vector<1x32xf32> to vector<18x32xf32>
    %123 = arith.addf %120, %122 : vector<18x32xf32>
    %c0_53 = arith.constant 0 : index
    %c0_54 = arith.constant 0 : index
    %124 = vector.load %arg16[%c0_53, %c0_54] : memref<1x32xf32, #tpu.memory_space<vmem>>, vector<1x32xf32>
    %c0_55 = arith.constant 0 : index
    %c0_56 = arith.constant 0 : index
    %125 = vector.load %arg17[%c0_55, %c0_56] : memref<1x32xf32, #tpu.memory_space<vmem>>, vector<1x32xf32>
    %cst_57 = arith.constant dense<0.000000e+00> : vector<18xf32>
    %126 = vector.multi_reduction <add>, %123, %cst_57 [1] : vector<18x32xf32> to vector<18xf32>
    %127 = vector.shape_cast %126 : vector<18xf32> to vector<18x1xf32>
    %cst_58 = arith.constant 3.200000e+01 : f32
    %128 = vector.broadcast %cst_58 : f32 to vector<18x1xf32>
    %129 = arith.divf %127, %128 : vector<18x1xf32>
    %130 = vector.broadcast %129 : vector<18x1xf32> to vector<18x32xf32>
    %131 = arith.subf %123, %130 : vector<18x32xf32>
    %132 = arith.mulf %131, %131 : vector<18x32xf32>
    %cst_59 = arith.constant dense<0.000000e+00> : vector<18xf32>
    %133 = vector.multi_reduction <add>, %132, %cst_59 [1] : vector<18x32xf32> to vector<18xf32>
    %134 = vector.shape_cast %133 : vector<18xf32> to vector<18x1xf32>
    %cst_60 = arith.constant 3.200000e+01 : f32
    %135 = vector.broadcast %cst_60 : f32 to vector<18x1xf32>
    %136 = arith.divf %134, %135 : vector<18x1xf32>
    %137 = vector.broadcast %129 : vector<18x1xf32> to vector<18x32xf32>
    %138 = arith.subf %123, %137 : vector<18x32xf32>
    %cst_61 = arith.constant 9.99999974E-6 : f32
    %139 = vector.broadcast %cst_61 : f32 to vector<18x1xf32>
    %140 = arith.addf %136, %139 : vector<18x1xf32>
    %141 = math.rsqrt %140 : vector<18x1xf32>
    %142 = vector.broadcast %141 : vector<18x1xf32> to vector<18x32xf32>
    %143 = arith.mulf %138, %142 : vector<18x32xf32>
    %144 = vector.broadcast %124 : vector<1x32xf32> to vector<18x32xf32>
    %145 = arith.mulf %143, %144 : vector<18x32xf32>
    %146 = vector.broadcast %125 : vector<1x32xf32> to vector<18x32xf32>
    %147 = arith.addf %145, %146 : vector<18x32xf32>
    %c0_62 = arith.constant 0 : index
    %c0_63 = arith.constant 0 : index
    %148 = vector.load %arg18[%c0_62, %c0_63] : memref<32x96xf32, #tpu.memory_space<vmem>>, vector<32x96xf32>
    %cst_64 = arith.constant dense<0.000000e+00> : vector<18x96xf32>
    %149 = tpu.matmul %147, %148, %cst_64 {dimension_numbers = #tpu.dot_dimension_numbers<[1], [0], [0], [1], [0, 0, 1, 1], [], []>} : vector<18x32xf32>, vector<32x96xf32>, vector<18x96xf32> -> vector<18x96xf32>
    %150 = vector.extract_strided_slice %149 {offsets = [0, 0], sizes = [18, 32], strides = [1, 1]} : vector<18x96xf32> to vector<18x32xf32>
    %cst_65 = arith.constant 0.353553385 : f32
    %151 = vector.broadcast %cst_65 : f32 to vector<18x32xf32>
    %152 = arith.mulf %150, %151 : vector<18x32xf32>
    %153 = vector.extract_strided_slice %149 {offsets = [0, 32], sizes = [18, 32], strides = [1, 1]} : vector<18x96xf32> to vector<18x32xf32>
    %154 = vector.extract_strided_slice %149 {offsets = [0, 64], sizes = [18, 32], strides = [1, 1]} : vector<18x96xf32> to vector<18x32xf32>
    %155 = vector.extract_strided_slice %152 {offsets = [0, 0], sizes = [18, 8], strides = [1, 1]} : vector<18x32xf32> to vector<18x8xf32>
    %156 = vector.extract_strided_slice %152 {offsets = [0, 8], sizes = [18, 8], strides = [1, 1]} : vector<18x32xf32> to vector<18x8xf32>
    %157 = vector.extract_strided_slice %152 {offsets = [0, 16], sizes = [18, 8], strides = [1, 1]} : vector<18x32xf32> to vector<18x8xf32>
    %158 = vector.extract_strided_slice %152 {offsets = [0, 24], sizes = [18, 8], strides = [1, 1]} : vector<18x32xf32> to vector<18x8xf32>
    %159 = tpu.concatenate %155, %156, %157, %158 in 0 : vector<18x8xf32>, vector<18x8xf32>, vector<18x8xf32>, vector<18x8xf32> -> vector<72x8xf32>
    %160 = vector.extract_strided_slice %153 {offsets = [0, 0], sizes = [18, 8], strides = [1, 1]} : vector<18x32xf32> to vector<18x8xf32>
    %161 = vector.extract_strided_slice %153 {offsets = [0, 8], sizes = [18, 8], strides = [1, 1]} : vector<18x32xf32> to vector<18x8xf32>
    %162 = vector.extract_strided_slice %153 {offsets = [0, 16], sizes = [18, 8], strides = [1, 1]} : vector<18x32xf32> to vector<18x8xf32>
    %163 = vector.extract_strided_slice %153 {offsets = [0, 24], sizes = [18, 8], strides = [1, 1]} : vector<18x32xf32> to vector<18x8xf32>
    %164 = tpu.concatenate %160, %161, %162, %163 in 0 : vector<18x8xf32>, vector<18x8xf32>, vector<18x8xf32>, vector<18x8xf32> -> vector<72x8xf32>
    %165 = vector.extract_strided_slice %154 {offsets = [0, 0], sizes = [18, 8], strides = [1, 1]} : vector<18x32xf32> to vector<18x8xf32>
    %166 = vector.extract_strided_slice %154 {offsets = [0, 8], sizes = [18, 8], strides = [1, 1]} : vector<18x32xf32> to vector<18x8xf32>
    %167 = vector.extract_strided_slice %154 {offsets = [0, 16], sizes = [18, 8], strides = [1, 1]} : vector<18x32xf32> to vector<18x8xf32>
    %168 = vector.extract_strided_slice %154 {offsets = [0, 24], sizes = [18, 8], strides = [1, 1]} : vector<18x32xf32> to vector<18x8xf32>
    %169 = tpu.concatenate %165, %166, %167, %168 in 0 : vector<18x8xf32>, vector<18x8xf32>, vector<18x8xf32>, vector<18x8xf32> -> vector<72x8xf32>
    %cst_66 = arith.constant dense<0.000000e+00> : vector<72x72xf32>
    %170 = tpu.matmul %159, %164, %cst_66 {dimension_numbers = #tpu.dot_dimension_numbers<[1], [1], [0], [0], [0, 0, 1, 0], [], []>} : vector<72x8xf32>, vector<72x8xf32>, vector<72x72xf32> -> vector<72x72xf32>
    %171 = arith.addf %170, %10 : vector<72x72xf32>
    %cst_67 = arith.constant dense<0xFF800000> : vector<72xf32>
    %172 = vector.multi_reduction <maximumf>, %171, %cst_67 [1] : vector<72x72xf32> to vector<72xf32>
    %173 = vector.shape_cast %172 : vector<72xf32> to vector<72x1xf32>
    %174 = vector.broadcast %173 : vector<72x1xf32> to vector<72x72xf32>
    %175 = arith.subf %171, %174 : vector<72x72xf32>
    %176 = math.exp %175 : vector<72x72xf32>
    %cst_68 = arith.constant dense<0.000000e+00> : vector<72xf32>
    %177 = vector.multi_reduction <add>, %176, %cst_68 [1] : vector<72x72xf32> to vector<72xf32>
    %178 = vector.shape_cast %177 : vector<72xf32> to vector<72x1xf32>
    %179 = tpu.reciprocal %178 {approx = true} : vector<72x1xf32> -> vector<72x1xf32>
    %180 = vector.broadcast %179 : vector<72x1xf32> to vector<72x72xf32>
    %181 = arith.mulf %176, %180 : vector<72x72xf32>
    %cst_69 = arith.constant dense<0.000000e+00> : vector<72x8xf32>
    %182 = tpu.matmul %181, %169, %cst_69 {dimension_numbers = #tpu.dot_dimension_numbers<[1], [0], [0], [1], [0, 0, 1, 1], [], []>} : vector<72x72xf32>, vector<72x8xf32>, vector<72x8xf32> -> vector<72x8xf32>
    %183 = vector.extract_strided_slice %182 {offsets = [0, 0], sizes = [18, 8], strides = [1, 1]} : vector<72x8xf32> to vector<18x8xf32>
    %184 = vector.extract_strided_slice %182 {offsets = [18, 0], sizes = [18, 8], strides = [1, 1]} : vector<72x8xf32> to vector<18x8xf32>
    %185 = vector.extract_strided_slice %182 {offsets = [36, 0], sizes = [18, 8], strides = [1, 1]} : vector<72x8xf32> to vector<18x8xf32>
    %186 = vector.extract_strided_slice %182 {offsets = [54, 0], sizes = [18, 8], strides = [1, 1]} : vector<72x8xf32> to vector<18x8xf32>
    %187 = tpu.concatenate %183, %184, %185, %186 in 1 : vector<18x8xf32>, vector<18x8xf32>, vector<18x8xf32>, vector<18x8xf32> -> vector<18x32xf32>
    %c0_70 = arith.constant 0 : index
    %c0_71 = arith.constant 0 : index
    %188 = vector.load %arg19[%c0_70, %c0_71] : memref<32x32xf32, #tpu.memory_space<vmem>>, vector<32x32xf32>
    %cst_72 = arith.constant dense<0.000000e+00> : vector<18x32xf32>
    %189 = tpu.matmul %187, %188, %cst_72 {dimension_numbers = #tpu.dot_dimension_numbers<[1], [0], [0], [1], [0, 0, 1, 1], [], []>} : vector<18x32xf32>, vector<32x32xf32>, vector<18x32xf32> -> vector<18x32xf32>
    %c0_73 = arith.constant 0 : index
    %c0_74 = arith.constant 0 : index
    %190 = vector.load %arg20[%c0_73, %c0_74] : memref<1x32xf32, #tpu.memory_space<vmem>>, vector<1x32xf32>
    %191 = vector.broadcast %190 : vector<1x32xf32> to vector<18x32xf32>
    %192 = arith.addf %189, %191 : vector<18x32xf32>
    %193 = arith.addf %123, %192 : vector<18x32xf32>
    %c0_75 = arith.constant 0 : index
    %c0_76 = arith.constant 0 : index
    %194 = vector.load %arg21[%c0_75, %c0_76] : memref<1x32xf32, #tpu.memory_space<vmem>>, vector<1x32xf32>
    %c0_77 = arith.constant 0 : index
    %c0_78 = arith.constant 0 : index
    %195 = vector.load %arg22[%c0_77, %c0_78] : memref<1x32xf32, #tpu.memory_space<vmem>>, vector<1x32xf32>
    %cst_79 = arith.constant dense<0.000000e+00> : vector<18xf32>
    %196 = vector.multi_reduction <add>, %193, %cst_79 [1] : vector<18x32xf32> to vector<18xf32>
    %197 = vector.shape_cast %196 : vector<18xf32> to vector<18x1xf32>
    %cst_80 = arith.constant 3.200000e+01 : f32
    %198 = vector.broadcast %cst_80 : f32 to vector<18x1xf32>
    %199 = arith.divf %197, %198 : vector<18x1xf32>
    %200 = vector.broadcast %199 : vector<18x1xf32> to vector<18x32xf32>
    %201 = arith.subf %193, %200 : vector<18x32xf32>
    %202 = arith.mulf %201, %201 : vector<18x32xf32>
    %cst_81 = arith.constant dense<0.000000e+00> : vector<18xf32>
    %203 = vector.multi_reduction <add>, %202, %cst_81 [1] : vector<18x32xf32> to vector<18xf32>
    %204 = vector.shape_cast %203 : vector<18xf32> to vector<18x1xf32>
    %cst_82 = arith.constant 3.200000e+01 : f32
    %205 = vector.broadcast %cst_82 : f32 to vector<18x1xf32>
    %206 = arith.divf %204, %205 : vector<18x1xf32>
    %207 = vector.broadcast %199 : vector<18x1xf32> to vector<18x32xf32>
    %208 = arith.subf %193, %207 : vector<18x32xf32>
    %cst_83 = arith.constant 9.99999974E-6 : f32
    %209 = vector.broadcast %cst_83 : f32 to vector<18x1xf32>
    %210 = arith.addf %206, %209 : vector<18x1xf32>
    %211 = math.rsqrt %210 : vector<18x1xf32>
    %212 = vector.broadcast %211 : vector<18x1xf32> to vector<18x32xf32>
    %213 = arith.mulf %208, %212 : vector<18x32xf32>
    %214 = vector.broadcast %194 : vector<1x32xf32> to vector<18x32xf32>
    %215 = arith.mulf %213, %214 : vector<18x32xf32>
    %216 = vector.broadcast %195 : vector<1x32xf32> to vector<18x32xf32>
    %217 = arith.addf %215, %216 : vector<18x32xf32>
    %c0_84 = arith.constant 0 : index
    %c0_85 = arith.constant 0 : index
    %218 = vector.load %arg23[%c0_84, %c0_85] : memref<32x128xf32, #tpu.memory_space<vmem>>, vector<32x128xf32>
    %cst_86 = arith.constant dense<0.000000e+00> : vector<18x128xf32>
    %219 = tpu.matmul %217, %218, %cst_86 {dimension_numbers = #tpu.dot_dimension_numbers<[1], [0], [0], [1], [0, 0, 1, 1], [], []>} : vector<18x32xf32>, vector<32x128xf32>, vector<18x128xf32> -> vector<18x128xf32>
    %c0_87 = arith.constant 0 : index
    %c0_88 = arith.constant 0 : index
    %220 = vector.load %arg24[%c0_87, %c0_88] : memref<1x128xf32, #tpu.memory_space<vmem>>, vector<1x128xf32>
    %221 = vector.broadcast %220 : vector<1x128xf32> to vector<18x128xf32>
    %222 = arith.addf %219, %221 : vector<18x128xf32>
    %cst_89 = arith.constant 5.000000e-01 : f32
    %223 = vector.broadcast %cst_89 : f32 to vector<18x128xf32>
    %224 = arith.mulf %223, %222 : vector<18x128xf32>
    %cst_90 = arith.constant 0.707106769 : f32
    %225 = vector.broadcast %cst_90 : f32 to vector<18x128xf32>
    %226 = arith.mulf %222, %225 : vector<18x128xf32>
    %227 = math.erf %226 : vector<18x128xf32>
    %cst_91 = arith.constant 1.000000e+00 : f32
    %228 = vector.broadcast %cst_91 : f32 to vector<18x128xf32>
    %229 = arith.addf %228, %227 : vector<18x128xf32>
    %230 = arith.mulf %224, %229 : vector<18x128xf32>
    %c0_92 = arith.constant 0 : index
    %c0_93 = arith.constant 0 : index
    %231 = vector.load %arg25[%c0_92, %c0_93] : memref<128x32xf32, #tpu.memory_space<vmem>>, vector<128x32xf32>
    %cst_94 = arith.constant dense<0.000000e+00> : vector<18x32xf32>
    %232 = tpu.matmul %230, %231, %cst_94 {dimension_numbers = #tpu.dot_dimension_numbers<[1], [0], [0], [1], [0, 0, 1, 1], [], []>} : vector<18x128xf32>, vector<128x32xf32>, vector<18x32xf32> -> vector<18x32xf32>
    %233 = arith.addf %193, %232 : vector<18x32xf32>
    %c0_95 = arith.constant 0 : index
    %c0_96 = arith.constant 0 : index
    %234 = vector.load %arg26[%c0_95, %c0_96] : memref<1x32xf32, #tpu.memory_space<vmem>>, vector<1x32xf32>
    %235 = vector.broadcast %234 : vector<1x32xf32> to vector<18x32xf32>
    %236 = arith.addf %233, %235 : vector<18x32xf32>
    %c0_97 = arith.constant 0 : index
    %c0_98 = arith.constant 0 : index
    %237 = vector.load %arg27[%c0_97, %c0_98] : memref<1x32xf32, #tpu.memory_space<vmem>>, vector<1x32xf32>
    %c0_99 = arith.constant 0 : index
    %c0_100 = arith.constant 0 : index
    %238 = vector.load %arg28[%c0_99, %c0_100] : memref<1x32xf32, #tpu.memory_space<vmem>>, vector<1x32xf32>
    %cst_101 = arith.constant dense<0.000000e+00> : vector<18xf32>
    %239 = vector.multi_reduction <add>, %236, %cst_101 [1] : vector<18x32xf32> to vector<18xf32>
    %240 = vector.shape_cast %239 : vector<18xf32> to vector<18x1xf32>
    %cst_102 = arith.constant 3.200000e+01 : f32
    %241 = vector.broadcast %cst_102 : f32 to vector<18x1xf32>
    %242 = arith.divf %240, %241 : vector<18x1xf32>
    %243 = vector.broadcast %242 : vector<18x1xf32> to vector<18x32xf32>
    %244 = arith.subf %236, %243 : vector<18x32xf32>
    %245 = arith.mulf %244, %244 : vector<18x32xf32>
    %cst_103 = arith.constant dense<0.000000e+00> : vector<18xf32>
    %246 = vector.multi_reduction <add>, %245, %cst_103 [1] : vector<18x32xf32> to vector<18xf32>
    %247 = vector.shape_cast %246 : vector<18xf32> to vector<18x1xf32>
    %cst_104 = arith.constant 3.200000e+01 : f32
    %248 = vector.broadcast %cst_104 : f32 to vector<18x1xf32>
    %249 = arith.divf %247, %248 : vector<18x1xf32>
    %250 = vector.broadcast %242 : vector<18x1xf32> to vector<18x32xf32>
    %251 = arith.subf %236, %250 : vector<18x32xf32>
    %cst_105 = arith.constant 9.99999974E-6 : f32
    %252 = vector.broadcast %cst_105 : f32 to vector<18x1xf32>
    %253 = arith.addf %249, %252 : vector<18x1xf32>
    %254 = math.rsqrt %253 : vector<18x1xf32>
    %255 = vector.broadcast %254 : vector<18x1xf32> to vector<18x32xf32>
    %256 = arith.mulf %251, %255 : vector<18x32xf32>
    %257 = vector.broadcast %237 : vector<1x32xf32> to vector<18x32xf32>
    %258 = arith.mulf %256, %257 : vector<18x32xf32>
    %259 = vector.broadcast %238 : vector<1x32xf32> to vector<18x32xf32>
    %260 = arith.addf %258, %259 : vector<18x32xf32>
    %c0_106 = arith.constant 0 : index
    %c0_107 = arith.constant 0 : index
    %261 = vector.load %arg29[%c0_106, %c0_107] : memref<18x32xf32, #tpu.memory_space<vmem>>, vector<18x32xf32>
    tpu.vector_store %arg29[%c0_106, %c0_107], %260 {strides = array<i32>} : memref<18x32xf32, #tpu.memory_space<vmem>>, vector<18x32xf32>,
    return
  }
}

</mosaic_0001>

<bundles_post_ra>
// kernel: tpu_custom_call.1
= control target key start
LH: loop header
LB: loop body
LE: loop exit
PB: predicated region body
PF: predicated region fallthrough
CT: control target
= control target key end

     0   :  { %s3681_s6 = smov 1   ;;  %s3682_s10 = smov 2   ;;  %s4671_s0 = inlined_call_operand.smem [shape: u32[30], index: -1, kind: input, shape index: {}] }
   0x1   :  { %s3731_s5 = sld [smem:[%s4671_s0]]   ;;  %s3683_s14 = smov 3  }
   0x2   :  { %s3736_s9 = sld [smem:[%s4671_s0 + %s3681_s6]]   ;;  %s3684_s18 = smov 4  }
   0x3   :  { %s3741_s13 = sld [smem:[%s4671_s0 + %s3682_s10]]   ;;  %s3685_s22 = smov 5  }
   0x4   :  { %s3746_s17 = sld [smem:[%s4671_s0 + %s3683_s14]]   ;;  %s3686_s26 = smov 6  }
   0x5   :  { %s3751_s21 = sld [smem:[%s4671_s0 + %s3684_s18]]   ;;  %s3687_s30 = smov 7  }
   0x6   :  { %s3756_s25 = sld [smem:[%s4671_s0 + %s3685_s22]]   ;;  %s3688_s4 = smov 8  }
   0x7   :  { %s3761_s29 = sld [smem:[%s4671_s0 + %s3686_s26]]   ;;  %s3689_s10 = smov 9  }
   0x8   :  { %s3766_s3 = sld [smem:[%s4671_s0 + %s3687_s30]]   ;;  %s3690_s15 = smov 10  }
   0x9   :  { %s3771_s8 = sld [smem:[%s4671_s0 + %s3688_s4]]   ;;  %s3691_s20 = smov 11  }
   0xa   :  { %s3776_s14 = sld [smem:[%s4671_s0 + %s3689_s10]]   ;;  %s3692_s26 = smov 12  }
   0xb   :  { %s3781_s19 = sld [smem:[%s4671_s0 + %s3690_s15]]   ;;  %s3693_s1 = smov 13  }
   0xc   :  { %s3786_s24 = sld [smem:[%s4671_s0 + %s3691_s20]]   ;;  %s3694_s7 = smov 14  }
   0xd   :  { %s3791_s30 = sld [smem:[%s4671_s0 + %s3692_s26]]   ;;  %s3695_s15 = smov 15  }
   0xe   :  { %s3796_s6 = sld [smem:[%s4671_s0 + %s3693_s1]]   ;;  %s3696_s22 = smov 16  }
   0xf   :  { %s3801_s12 = sld [smem:[%s4671_s0 + %s3694_s7]]   ;;  %s3697_s28 = smov 17  }
  0x10   :  { %s3806_s20 = sld [smem:[%s4671_s0 + %s3695_s15]]   ;;  %s3698_s7 = smov 18  }
  0x11   :  { %s3811_s27 = sld [smem:[%s4671_s0 + %s3696_s22]]   ;;  %s3699_s15 = smov 19  }
  0x12   :  { %s3816_s4 = sld [smem:[%s4671_s0 + %s3697_s28]]   ;;  %s3700_s22 = smov 20  }
  0x13   :  { %s3701_s28 = smov 21  }
  0x14   :  { %4676 = sst [smem:[#allocation5_spill]] %s3796_s6 }
  0x15   :  { %s3821_s6 = sld [smem:[%s4671_s0 + %s3698_s7]]   ;;  %s3702_s7 = smov 22  }
  0x16   :  { %4677 = sst [smem:[#allocation6_spill]] %s3806_s20 }
  0x17   :  { %4678 = sst [smem:[#allocation7_spill]] %s3811_s27 }
  0x18   :  { %4679 = sst [smem:[#allocation8_spill]] %s3816_s4 }
  0x19   :  { %s3826_s20 = sld [smem:[%s4671_s0 + %s3699_s15]]   ;;  %s3703_s15 = smov 23  }
  0x1a   :  { %s3831_s27 = sld [smem:[%s4671_s0 + %s3700_s22]]   ;;  %s3704_s22 = smov 24  }
  0x1b   :  { %4680 = sst [smem:[#allocation9_spill]] %s3821_s6 }
  0x1c   :  { %s3836_s4 = sld [smem:[%s4671_s0 + %s3701_s28]]   ;;  %s3705_s28 = smov 25  }
  0x1d   :  { %s3841_s6 = sld [smem:[%s4671_s0 + %s3702_s7]]   ;;  %s3706_s7 = smov 26  }
  0x1f   :  { %4681 = sst [smem:[#allocation10_spill]] %s3826_s20 }
  0x20   :  { %4682 = sst [smem:[#allocation11_spill]] %s3831_s27 }
  0x21   :  { %s3846_s20 = sld [smem:[%s4671_s0 + %s3703_s15]]   ;;  %s3707_s15 = smov 27  }
  0x22   :  { %4683 = sst [smem:[#allocation12_spill]] %s3836_s4 }
  0x23   :  { %4684 = sst [smem:[#allocation13_spill]] %s3841_s6 }
  0x24   :  { %s3851_s27 = sld [smem:[%s4671_s0 + %s3704_s22]]   ;;  %s3708_s22 = smov 28  }
  0x25   :  { %s3856_s4 = sld [smem:[%s4671_s0 + %s3705_s28]]   ;;  %s3709_s28 = smov 29  }
  0x26   :  { %s3861_s6 = sld [smem:[%s4671_s0 + %s3706_s7]]  }
  0x27   :  { %4685 = sst [smem:[#allocation14_spill]] %s3846_s20 }
  0x28   :  { %s3866_s20 = sld [smem:[%s4671_s0 + %s3707_s15]]  }
  0x2a   :  { %4686 = sst [smem:[#allocation15_spill]] %s3851_s27 }
  0x2b   :  { %4687 = sst [smem:[#allocation16_spill]] %s3856_s4 }
  0x2c   :  { %s3871_s27 = sld [smem:[%s4671_s0 + %s3708_s22]]  }
  0x2d   :  { %s3876_s4 = sld [smem:[%s4671_s0 + %s3709_s28]]  }
  0x2e   :  { %v125_v0 = vld [vmem:[%s3736_s9] sm:$0xff]  ;;  %v126_v1 = vld [vmem:[%s3736_s9 + $0x8] sm:$0xff]  ;;  %v127_v2 = vld [vmem:[%s3736_s9 + $0x10] sm:$0xff]  ;;  %vm137_vm0 = vcmask 285696  }
  0x2f   :  { %v3234_v3 = vpack.c.bf16 %v126_v1, %v125_v0  ;;  %v128_v4 = vld [vmem:[%s3736_s9 + $0x18] sm:$0xff]  ;;  %v123_v5 = vld [vmem:[%s3731_s5] sm:$0xff] }
  0x30   :  { %v3238_v6 = vpack.c.bf16 %v128_v4, %v127_v2  ;;  %2867 = vmatprep.mubr.msk.f32.mxu1 %vm137_vm0, %v123_v5 }
  0x31   :  { %64 = vsyncpa [#allocation3], 0  ;;  %3235 = vmatprep.subr.bf16.mxu1 %v3234_v3  ;;  %v129_v7 = vld [vmem:[%s3736_s9 + $0x20] sm:$0x7]  ;;  %vm144_vm1 = vcmask 1042432   ;;  %v124_v8 = vld [vmem:[%s3731_s5 + $0x8] sm:$0xff]  ;;  %v228_v9 = vlaneseq }
  0x32   :  { %3237 = vmatpush3.bf16.msra.mxu1 %v3234_v3  ;;  %v2606_v11 = vld [vmem:[%s3741_s13] ss:$0 sm:$0xff]  ;;  %vm259_vm2 = vcmask 254976   ;;  %vm236_vm3 = vcmask 1040384   ;;  %vm252_vm4 = vcmask 261120   ;;  %vm239_vm5 = vcmask 1041408  }
  0x33   :  { %3239 = vmatprep.subr.bf16.mxu1 %v3238_v6  ;;  %v229_v10 = vshrl.u32 %v228_v9, 7  ;;  %v223_v13 = vld [vmem:[%s3746_s17] sm:$0x1]  ;;  %v313_v43 = vld [vmem:[%s3766_s3 + $0x8] sm:$0xff]  ;;  %v3710_v45 = vmov 0.0|0.0   ;;  %v314_v46 = vld [vmem:[%s3766_s3 + $0x10] sm:$0xff] }
  0x34   :  { %v312_v42 = vld [vmem:[%s3766_s3] sm:$0xff]  ;;  %3264 = vmatprep.subr.bf16.mxu0 %v3710_v45  ;;  %v315_v47 = vld [vmem:[%s3766_s3 + $0x18] sm:$0xff]  ;;  %vm3711_vm6 = vmmov 0   ;;  %v3712_v49 = vmov 0.0   ;;  %vm438_vm7 = vcmask 1045504   ;;  %vm424_vm8 = vcmask 1043456  }
  0x35   :  { %v230_v12 = vsub.s32 0, %v229_v10  ;;  %v3243_v44 = vpack.c.bf16 %v313_v43, %v312_v42  ;;  %v3246_v48 = vpack.c.bf16 %v315_v47, %v314_v46  ;;  %2950 = vmatprep.mubr.msk.f32.mxu0 %vm3711_vm6, %v3712_v49  ;;  %v2610_v60 = vld [vmem:[%s3756_s25] ss:$0 sm:$0xff]  ;;  %s3713_s0 = smov 120   ;;  %s3714_s5 = smov 104   ;;  %vm519_vm9 = vcmask 64512  }
  0x36   :  { %3241 = vmatpush3.bf16.msra.mxu1 %v3238_v6  ;;  %v2611_v62 = vld [vmem:[%s3761_s29] ss:$0 sm:$0xff]  ;;  %s3715_s9 = smov 112   ;;  %s3716_s13 = smov 96   ;;  %vm3964_vm10 = vmpackc.low %vm519_vm9, %vm519_vm9  ;;  %vm669_vm11 = vcmask 588800   ;;  %vm985_vm12 = vcmask 130048  }
  0x37   :  { %2865 = vmatprep.subr.msk.mxu1 %vm144_vm1, %v129_v7  ;;  %v231_v18 = vrot.slane %v223_v13, %v230_v12  ;;  %s3717_s17 = smov 64   ;;  %s3718_s25 = smov 8   ;;  %vm989_vm13 = vcmask 195584  }
  0x38   :  { %s3719_s29 = smov 16   ;;  %s3720_s3 = smov 24  }
  0x39   :  { %s4697_s7 = sld [smem:[#allocation14_spill]]  ;;  %s4698_s10 = sld [smem:[#allocation16_spill]] }
  0x3a   :  { %2866 = vmatpush3.msk.msra.mxu1 %vm144_vm1, %v129_v7  ;;  %s4699_s11 = sld [smem:[#allocation12_spill]]  ;;  %s4700_s15 = sld [smem:[#allocation13_spill]] }
  0x3b   :  { %2868 = vmatmul.mubr.msk.f32.vlgmr.msra.gmra.mrb[0].mxu1 %vm137_vm0, %v124_v8  ;;  %3242 = vmatprep.subr.bf16.mxu1 %v3710_v45  ;;  %s4701_s16 = sld [smem:[#allocation15_spill]] }
  0x3c   :  { %3244 = vmatpush3.bf16.msra.mxu1 %v3243_v44  ;;  %2878 = vmatprep.mubr.msk.f32.mxu1 %vm3711_vm6, %v3712_v49 }
  0x3d   :  { %3245 = vmatprep.subr.bf16.mxu1 %v3710_v45 }
  0x40   :  { %3247 = vmatpush3.bf16.msra.mxu1 %v3246_v48 }
  0x41   :  { %3248 = vmatprep.subr.bf16.mxu1 %v3710_v45 }
 0x10e   :  { %v2869_v14 = vpop.f32.mrb[0].mxu1 }
 0x10f   :  { %v220_v15 = vadd.f32 %v2869_v14, %v2606_v11  ;;  %v214_v16 = vpop.f32.mrb[1].mxu1 }
 0x110   :  { %v215_v17 = vadd.f32 %v2606_v11, %v214_v16 }
 0x111   :  { %v3889_v19 = vrot.slane %v220_v15, 6 }
 0x112   :  { %v225_v20 = vrot.slane %v215_v17, 7 }
 0x113   :  { %v260_v21 = vsel %vm259_vm2, %v3889_v19, 0.0 }
 0x114   :  { %261 = vadd.xlane.f32.xlu1 %v260_v21  ;;  %v3893_v22 = vsel %vm236_vm3, %v223_v13, %v225_v20  ;;  %v238_v23 = vsel %vm236_vm3, %v225_v20, %v231_v18 }
 0x115   :  { %v253_v24 = vsel %vm252_vm4, %v3893_v22, 0.0  ;;  %v3899_v25 = vsel %vm239_vm5, %v238_v23, %v3889_v19 }
 0x116   :  { %254 = vadd.xlane.f32.xlu0 %v253_v24  ;;  %v256_v26 = vsel %vm252_vm4, %v3899_v25, 0.0 }
 0x11a   :  { %257 = vadd.xlane.f32.xlu0 %v256_v26 }
 0x1a1   :  { %v262_v27 = vpop.xlane.xlu1 %261 }
 0x1a2   :  { %v266_v28 = vmul.f32 0.03125, %v262_v27 }
 0x1a3   :  { %v255_v29 = vpop.xlane.xlu0 %254 }
 0x1a4   :  { %v264_v30 = vmul.f32 0.03125, %v255_v29  ;;  %v269_v31 = vsub.f32 %v3889_v19, %v266_v28 }
 0x1a6   :  { %v267_v32 = vsub.f32 %v3893_v22, %v264_v30  ;;  %v272_v38 = vmul.f32 %v269_v31, %v269_v31 }
 0x1a7   :  { %v258_v33 = vpop.xlane.xlu0 %257 }
 0x1a8   :  { %v265_v34 = vmul.f32 0.03125, %v258_v33  ;;  %v270_v35 = vmul.f32 %v267_v32, %v267_v32  ;;  %v279_v40 = vsel %vm259_vm2, %v272_v38, 0.0 }
 0x1aa   :  { %v268_v36 = vsub.f32 %v3899_v25, %v265_v34  ;;  %v273_v37 = vsel %vm252_vm4, %v270_v35, 0.0 }
 0x1ab   :  { %274 = vadd.xlane.f32.xlu1 %v273_v37 }
 0x1ac   :  { %v271_v39 = vmul.f32 %v268_v36, %v268_v36 }
 0x1ae   :  { %v276_v41 = vsel %vm252_vm4, %v271_v39, 0.0 }
 0x1af   :  { %280 = vadd.xlane.f32.xlu1 %v279_v40  ;;  %277 = vadd.xlane.f32.xlu0 %v276_v41 }
 0x238   :  { %v275_v50 = vpop.xlane.xlu1 %274 }
 0x239   :  { %v282_v51 = vmul.f32 0.03125, %v275_v50 }
 0x23b   :  { %v285_v52 = vadd.f32 1e-05, %v282_v51 }
 0x23c   :  { %v281_v53 = vpop.xlane.xlu1 %280  ;;  %v278_v54 = vpop.xlane.xlu0 %277 }
 0x23d   :  { %3534 = vrsqrt.f32 %v285_v52  ;;  %v284_v55 = vmul.f32 0.03125, %v281_v53  ;;  %v283_v56 = vmul.f32 0.03125, %v278_v54 }
 0x23f   :  { %v287_v57 = vadd.f32 1e-05, %v284_v55  ;;  %v286_v58 = vadd.f32 1e-05, %v283_v56 }
 0x241   :  { %3536 = vrsqrt.f32 %v287_v57 }
 0x242   :  { %3538 = vrsqrt.f32 %v286_v58 }
 0x247   :  { %v3535_v59 = vpop.eup %3534 }
 0x248   :  { %v291_v61 = vmul.f32 %v3535_v59, %v267_v32 }
 0x24a   :  { %v300_v63 = vmul.f32 %v2610_v60, %v291_v61 }
 0x24b   :  { %v3537_v0 = vpop.eup %3536 }
 0x24c   :  { %v3539_v1 = vpop.eup %3538  ;;  %v309_v2 = vadd.f32 %v2611_v62, %v300_v63  ;;  %v293_v4 = vmul.f32 %v3537_v0, %v269_v31 }
 0x24d   :  { %v292_v3 = vmul.f32 %v3539_v1, %v268_v36 }
 0x24e   :  { %2879 = vmatmul.mubr.msk.f32.vlgmr.msra.gmra.mrb[2].mxu1 %vm252_vm4, %v309_v2  ;;  %v302_v7 = vmul.f32 %v2610_v60, %v293_v4 }
 0x24f   :  { %2881 = vmatprep.mubr.msk.f32.mxu1 %vm3711_vm6, %v3712_v49  ;;  %v301_v5 = vmul.f32 %v2610_v60, %v292_v3 }
 0x250   :  { %v311_v8 = vadd.f32 %v2611_v62, %v302_v7 }
 0x251   :  { %v310_v6 = vadd.f32 %v2611_v62, %v301_v5 }
 0x253   :  { %2882 = vmatmul.mubr.msk.f32.gmra.mrb[4].mxu1 %vm252_vm4, %v310_v6 }
 0x254   :  { %2884 = vmatprep.mubr.msk.f32.mxu1 %vm3711_vm6, %v3712_v49 }
 0x257   :  { %2885 = vmatmul.mubr.msk.f32.gmra.mrb[6].mxu1 %vm252_vm4, %v311_v8 }
 0x258   :  { %2905 = vmatprep.mubr.msk.f32.mxu1 %vm3711_vm6, %v3712_v49 }
 0x321   :  { %v3932_v9 = vpop.f32.mrb[2].mxu1 }
 0x322   :  { %v2880_v10 = vpop.f32.mrb[3].mxu1  ;;  %v457_v12 = vrot.slane %v3932_v9, 6  ;;  %v483_v13 = vrot.slane %v3932_v9, 2  ;;  %v470_v17 = vrot.slane %v3932_v9, 4  ;;  %v3972_v61 = vmul.f32 0.35355338, %v3932_v9 }
 0x324   :  { %v411_v2 = vrot.slane %v3972_v61, 6  ;;  %v425_v7 = vrot.slane %v3972_v61, 4 }
 0x326   :  { %v396_v11 = vpop.f32.mrb[4].mxu1 }
 0x327   :  { %v2883_v14 = vpop.f32.mrb[5].mxu1  ;;  %v458_v15 = vrot.slane %v396_v11, 6  ;;  %v484_v16 = vrot.slane %v396_v11, 2  ;;  %v471_v18 = vrot.slane %v396_v11, 4  ;;  %v3938_v20 = vpack.i.bf16 %v396_v11, %v3932_v9 }
 0x328   :  { %v3968_v58 = vmul.f32 0.35355338, %v396_v11 }
 0x329   :  { %v459_v21 = vsel %vm239_vm5, %v457_v12, %v458_v15  ;;  %v485_v23 = vsel %vm438_vm7, %v483_v13, %v484_v16  ;;  %v472_v24 = vsel %vm424_vm8, %v470_v17, %v471_v18 }
 0x32a   :  { %v401_v26 = vpop.f32.mrb[6].mxu1  ;;  %v3424_v27 = vpack.i.bf16 %v459_v21, %v457_v12  ;;  %v3434_v28 = vpack.i.bf16 %v485_v23, %v483_v13  ;;  %v3429_v29 = vpack.i.bf16 %v472_v24, %v470_v17  ;;  %v412_v1 = vrot.slane %v3968_v58, 6 }
 0x32b   :  { %v2886_v30 = vpop.f32.mrb[7].mxu1  ;;  %v460_v31 = vrot.slane %v401_v26, 6  ;;  %v473_v32 = vrot.slane %v401_v26, 4  ;;  %v486_v33 = vrot.slane %v401_v26, 2  ;;  %v3978_v63 = vmul.f32 0.35355338, %v401_v26 }
 0x32c   :  { %3425 = vrot.lane.b32.xlu0 %v3424_v27, %s3713_s0  ;;  %v413_v4 = vsel %vm239_vm5, %v411_v2, %v412_v1  ;;  %v426_v6 = vrot.slane %v3968_v58, 4  ;;  %v440_v11 = vrot.slane %v3968_v58, 2  ;;  %v439_v12 = vrot.slane %v3972_v61, 2 }
 0x32d   :  { %v461_v34 = vsel %vm239_vm5, %v458_v15, %v460_v31  ;;  %v474_v35 = vsel %vm424_vm8, %v471_v18, %v473_v32  ;;  %v487_v36 = vsel %vm438_vm7, %v484_v16, %v486_v33  ;;  %v414_v3 = vrot.slane %v3978_v63, 6 }
 0x32e   :  { %466 = vrot.lane.b32.xlu1 %v461_v34, %s3713_s0  ;;  %v428_v8 = vrot.slane %v3978_v63, 4  ;;  %v427_v9 = vsel %vm424_vm8, %v425_v7, %v426_v6  ;;  %v442_v13 = vrot.slane %v3978_v63, 2  ;;  %v441_v14 = vsel %vm438_vm7, %v439_v12, %v440_v11 }
 0x32f   :  { %v415_v5 = vsel %vm239_vm5, %v412_v1, %v414_v3 }
 0x330   :  { %3435 = vrot.lane.b32.xlu0 %v3434_v28, %s3714_s5  ;;  %v429_v10 = vsel %vm424_vm8, %v426_v6, %v428_v8  ;;  %v443_v15 = vsel %vm438_vm7, %v440_v11, %v442_v13 }
 0x332   :  { %3430 = vrot.lane.b32.xlu1 %v3429_v29, %s3715_s9 }
 0x334   :  { %3440 = vrot.lane.b32.xlu0 %v3938_v20, %s3716_s13 }
 0x336   :  { %479 = vrot.lane.b32.xlu1 %v474_v35, %s3715_s9 }
 0x33a   :  { %492 = vrot.lane.b32.xlu1 %v487_v36, %s3714_s5 }
 0x39e   :  { %v3426_v37 = vpop.permute.xlu0 %3425 }
 0x39f   :  { %v3428_v38 = vunpack.i.h.bf16 %v3426_v37  ;;  %v3427_v39 = vunpack.i.l.bf16 %v3426_v37 }
 0x3a0   :  { %v467_v40 = vpop.permute.xlu1 %466 }
 0x3a1   :  { %v495_v41 = vsel %vm239_vm5, %v401_v26, %v3427_v39 }
 0x3a2   :  { %v3436_v42 = vpop.permute.xlu0 %3435  ;;  %v3955_v43 = vpack.i.bf16 %v3428_v38, %v495_v41 }
 0x3a3   :  { %v3437_v50 = vunpack.i.l.bf16 %v3436_v42  ;;  %v3438_v54 = vunpack.i.h.bf16 %v3436_v42 }
 0x3a4   :  { %3445 = vrot.lane.b32.xlu1 %v3955_v43, %s3716_s13  ;;  %v3431_v44 = vpop.permute.xlu1 %3430 }
 0x3a5   :  { %v3433_v46 = vunpack.i.h.bf16 %v3431_v44  ;;  %v3432_v47 = vunpack.i.l.bf16 %v3431_v44 }
 0x3a6   :  { %v3441_v48 = vpop.permute.xlu0 %3440 }
 0x3a7   :  { %v3443_v51 = vunpack.i.h.bf16 %v3441_v48  ;;  %v3442_v52 = vunpack.i.l.bf16 %v3441_v48  ;;  %v496_v53 = vsel %vm424_vm8, %v467_v40, %v3432_v47 }
 0x3a8   :  { %v480_v55 = vpop.permute.xlu1 %479  ;;  %v3960_v56 = vpack.i.bf16 %v3433_v46, %v496_v53 }
 0x3a9   :  { %v3249_v59 = vpack.c.bf16 %v3443_v51, %v3442_v52  ;;  %v497_v60 = vsel %vm438_vm7, %v480_v55, %v3437_v50  ;;  %v241_v51 = vld [vmem:[%s3751_s21] sm:$0xff]  ;;  %v242_v55 = vld [vmem:[%s3751_s21 + $0x8] sm:$0xff] }
 0x3aa   :  { %v3974_v62 = vpack.i.bf16 %v3438_v54, %v497_v60  ;;  %3450 = vrot.lane.b32.xlu0 %v3960_v56, %s3716_s13 }
 0x3ab   :  { %3251 = vmatpush3.bf16.xpose.msk.msra.mxu1 %vm3964_vm10, %v3249_v59 }
 0x3ac   :  { %3455 = vrot.lane.b32.xlu1 %v3974_v62, %s3716_s13  ;;  %v3984_v0 = vpop.permute.xlu1 %492  ;;  %3252 = vmatprep.subr.bf16.mxu1 %v3710_v45 }
 0x3ae   :  { %517 = vrot.lane.b32.xlu0 %v3984_v0, %s3716_s13 }
 0x3b0   :  { %416 = vrot.lane.b32.xlu1 %v411_v2, %s3713_s0 }
 0x3b2   :  { %418 = vrot.lane.b32.xlu0 %v413_v4, %s3713_s0 }
 0x3b4   :  { %420 = vrot.lane.b32.xlu1 %v415_v5, %s3713_s0  ;;  %v244_v5 = vld [vmem:[%s3751_s21 + $0x18] sm:$0xff] }
 0x3b6   :  { %430 = vrot.lane.b32.xlu0 %v425_v7, %s3715_s9 }
 0x3b8   :  { %432 = vrot.lane.b32.xlu1 %v427_v9, %s3715_s9 }
 0x3ba   :  { %434 = vrot.lane.b32.xlu0 %v429_v10, %s3715_s9  ;;  %v245_v10 = vld [vmem:[%s3751_s21 + $0x20] sm:$0xff] }
 0x3bc   :  { %444 = vrot.lane.b32.xlu1 %v439_v12, %s3714_s5 }
 0x3be   :  { %446 = vrot.lane.b32.xlu0 %v441_v14, %s3714_s5 }
 0x3c0   :  { %448 = vrot.lane.b32.xlu1 %v443_v15, %s3714_s5  ;;  %v246_v15 = vld [vmem:[%s3751_s21 + $0x28] sm:$0xff] }
 0x3c2   :  { %3460 = vrot.lane.b32.xlu0 %v3938_v20, %s3717_s17 }
 0x416   :  { %v3446_v16 = vpop.permute.xlu1 %3445 }
 0x417   :  { %v3448_v17 = vunpack.i.h.bf16 %v3446_v16  ;;  %v3447_v18 = vunpack.i.l.bf16 %v3446_v16 }
 0x419   :  { %v3253_v21 = vpack.c.bf16 %v3448_v17, %v3447_v18 }
 0x41b   :  { %3255 = vmatpush3.bf16.xpose.msk.msra.mxu1 %vm3964_vm10, %v3253_v21 }
 0x41c   :  { %v3451_v23 = vpop.permute.xlu0 %3450  ;;  %3256 = vmatprep.subr.bf16.mxu1 %v3710_v45 }
 0x41d   :  { %v3453_v24 = vunpack.i.h.bf16 %v3451_v23  ;;  %v3452_v26 = vunpack.i.l.bf16 %v3451_v23  ;;  %v247_v23 = vld [vmem:[%s3751_s21 + $0x30] sm:$0xff] }
 0x41e   :  { %v3456_v29 = vpop.permute.xlu1 %3455 }
 0x41f   :  { %v3257_v28 = vpack.c.bf16 %v3453_v24, %v3452_v26  ;;  %v3458_v20 = vunpack.i.h.bf16 %v3456_v29  ;;  %v3457_v31 = vunpack.i.l.bf16 %v3456_v29  ;;  %v248_v29 = vld [vmem:[%s3751_s21 + $0x38] sm:$0xff] }
 0x420   :  { %v518_v27 = vpop.permute.xlu0 %517 }
 0x421   :  { %v3261_v33 = vpack.c.bf16 %v3458_v20, %v3457_v31 }
 0x422   :  { %v417_v40 = vpop.permute.xlu1 %416 }
 0x423   :  { %3259 = vmatpush3.bf16.xpose.msk.msra.mxu1 %vm3964_vm10, %v3257_v28  ;;  %v451_v41 = vsel %vm239_vm5, %v3978_v63, %v417_v40  ;;  %v243_v63 = vld [vmem:[%s3751_s21 + $0x10] sm:$0xff] }
 0x424   :  { %v419_v30 = vpop.permute.xlu0 %418  ;;  %3260 = vmatprep.subr.bf16.mxu1 %v3710_v45 }
 0x426   :  { %v421_v42 = vpop.permute.xlu1 %420 }
 0x428   :  { %v431_v32 = vpop.permute.xlu0 %430 }
 0x429   :  { %v452_v46 = vsel %vm424_vm8, %v421_v42, %v431_v32 }
 0x42a   :  { %v433_v44 = vpop.permute.xlu1 %432 }
 0x42b   :  { %3263 = vmatpush3.bf16.xpose.msk.msra.mxu1 %vm3964_vm10, %v3261_v33  ;;  %v249_v33 = vld [vmem:[%s3751_s21 + $0x40] sm:$0xff] }
 0x42c   :  { %v435_v34 = vpop.permute.xlu0 %434  ;;  %2903 = vmatprep.subr.mxu1 %v3712_v49 }
 0x42e   :  { %v445_v47 = vpop.permute.xlu1 %444 }
 0x42f   :  { %v453_v48 = vsel %vm438_vm7, %v435_v34, %v445_v47 }
 0x430   :  { %v447_v35 = vpop.permute.xlu0 %446 }
 0x432   :  { %v449_v50 = vpop.permute.xlu1 %448 }
 0x433   :  { %2904 = vmatpush3.xpose.msk.msra.mxu1 %vm519_vm9, %v518_v27 }
 0x434   :  { %v3461_v36 = vpop.permute.xlu0 %3460  ;;  %3288 = vmatprep.subr.bf16.mxu1 %v3710_v45 }
 0x435   :  { %v3463_v37 = vunpack.i.h.bf16 %v3461_v36  ;;  %v3462_v38 = vunpack.i.l.bf16 %v3461_v36 }
 0x436   :  { %2906 = vmatmul.mubr.msk.f32.vlgmr.msra.gmra.mrb[8].mxu1 %vm519_vm9, %v3972_v61 }
 0x437   :  { %2908 = vmatprep.mubr.msk.f32.mxu1 %vm3711_vm6, %v3712_v49  ;;  %v3265_v39 = vpack.c.bf16 %v3463_v37, %v3462_v38 }
 0x439   :  { %3266 = vmatpush3.bf16.msra.mxu0 %v3265_v39 }
 0x43a   :  { %2909 = vmatmul.mubr.msk.f32.gmra.mrb[10].mxu1 %vm519_vm9, %v3968_v58  ;;  %3267 = vmatprep.subr.bf16.mxu0 %v3710_v45 }
 0x43b   :  { %2911 = vmatprep.mubr.msk.f32.mxu1 %vm3711_vm6, %v3712_v49 }
 0x43e   :  { %2912 = vmatmul.mubr.msk.f32.gmra.mrb[12].mxu1 %vm519_vm9, %v451_v41 }
 0x43f   :  { %2914 = vmatprep.mubr.msk.f32.mxu1 %vm3711_vm6, %v3712_v49 }
 0x442   :  { %2915 = vmatmul.mubr.msk.f32.gmra.mrb[14].mxu1 %vm519_vm9, %v419_v30 }
 0x443   :  { %2917 = vmatprep.mubr.msk.f32.mxu1 %vm3711_vm6, %v3712_v49 }
 0x446   :  { %2918 = vmatmul.mubr.msk.f32.gmra.mrb[16].mxu1 %vm519_vm9, %v452_v46 }
 0x447   :  { %2920 = vmatprep.mubr.msk.f32.mxu1 %vm3711_vm6, %v3712_v49 }
 0x44a   :  { %2921 = vmatmul.mubr.msk.f32.gmra.mrb[18].mxu1 %vm519_vm9, %v433_v44 }
 0x44b   :  { %2923 = vmatprep.mubr.msk.f32.mxu1 %vm3711_vm6, %v3712_v49 }
 0x44e   :  { %2924 = vmatmul.mubr.msk.f32.gmra.mrb[20].mxu1 %vm519_vm9, %v453_v48 }
 0x44f   :  { %2926 = vmatprep.mubr.msk.f32.mxu1 %vm3711_vm6, %v3712_v49 }
 0x452   :  { %2927 = vmatmul.mubr.msk.f32.gmra.mrb[22].mxu1 %vm519_vm9, %v447_v35 }
 0x453   :  { %2929 = vmatprep.mubr.msk.f32.mxu1 %vm3711_vm6, %v3712_v49 }
 0x456   :  { %2930 = vmatmul.mubr.msk.f32.gmra.mrb[24].mxu1 %vm519_vm9, %v449_v50 }
 0x457   :  { %3043 = vmatprep.mubr.msk.f32.mxu1 %vm3711_vm6, %v3712_v49 }
 0x509   :  { %v625_v52 = vpop.f32.mrb[8].mxu1 }
 0x50a   :  { %v626_v53 = vadd.f32 %v625_v52, %v241_v51  ;;  %v2907_v54 = vpop.f32.mrb[9].mxu1 }
 0x50c   :  { %v670_v58 = vsel %vm669_vm11, %v626_v53, -inf }
 0x50d   :  { %671 = vmax.xlane.f32.xlu0 %v670_v58  ;;  %v630_v59 = vpop.f32.mrb[10].mxu1 }
 0x50e   :  { %v631_v60 = vadd.f32 %v630_v59, %v242_v55  ;;  %v2910_v61 = vpop.f32.mrb[11].mxu1 }
 0x510   :  { %v673_v1 = vsel %vm669_vm11, %v631_v60, -inf }
 0x511   :  { %674 = vmax.xlane.f32.xlu1 %v673_v1  ;;  %v635_v2 = vpop.f32.mrb[12].mxu1 }
 0x512   :  { %v636_v3 = vadd.f32 %v635_v2, %v243_v63  ;;  %v2913_v4 = vpop.f32.mrb[13].mxu1 }
 0x514   :  { %v676_v6 = vsel %vm669_vm11, %v636_v3, -inf }
 0x515   :  { %677 = vmax.xlane.f32.xlu0 %v676_v6  ;;  %v640_v7 = vpop.f32.mrb[14].mxu1 }
 0x516   :  { %v641_v8 = vadd.f32 %v640_v7, %v244_v5  ;;  %v2916_v9 = vpop.f32.mrb[15].mxu1 }
 0x518   :  { %v679_v11 = vsel %vm669_vm11, %v641_v8, -inf }
 0x519   :  { %680 = vmax.xlane.f32.xlu0 %v679_v11  ;;  %v645_v12 = vpop.f32.mrb[16].mxu1 }
 0x51a   :  { %v646_v13 = vadd.f32 %v645_v12, %v245_v10  ;;  %v2919_v14 = vpop.f32.mrb[17].mxu1 }
 0x51c   :  { %v682_v16 = vsel %vm669_vm11, %v646_v13, -inf }
 0x51d   :  { %683 = vmax.xlane.f32.xlu0 %v682_v16  ;;  %v650_v17 = vpop.f32.mrb[18].mxu1 }
 0x51e   :  { %v651_v18 = vadd.f32 %v650_v17, %v246_v15  ;;  %v2922_v21 = vpop.f32.mrb[19].mxu1 }
 0x520   :  { %v685_v24 = vsel %vm669_vm11, %v651_v18, -inf }
 0x521   :  { %686 = vmax.xlane.f32.xlu1 %v685_v24  ;;  %v655_v26 = vpop.f32.mrb[20].mxu1 }
 0x522   :  { %v4073_v27 = vadd.f32 %v655_v26, %v247_v23  ;;  %v2925_v28 = vpop.f32.mrb[21].mxu1 }
 0x524   :  { %v688_v30 = vsel %vm669_vm11, %v4073_v27, -inf }
 0x525   :  { %689 = vmax.xlane.f32.xlu0 %v688_v30  ;;  %v660_v20 = vpop.f32.mrb[22].mxu1 }
 0x526   :  { %v4078_v31 = vadd.f32 %v660_v20, %v248_v29  ;;  %v2928_v32 = vpop.f32.mrb[23].mxu1 }
 0x528   :  { %v691_v34 = vsel %vm669_vm11, %v4078_v31, -inf }
 0x529   :  { %692 = vmax.xlane.f32.xlu1 %v691_v34  ;;  %v665_v35 = vpop.f32.mrb[24].mxu1 }
 0x52a   :  { %v4083_v36 = vadd.f32 %v665_v35, %v249_v33  ;;  %v2931_v37 = vpop.f32.mrb[25].mxu1 }
 0x52c   :  { %v694_v38 = vsel %vm669_vm11, %v4083_v36, -inf }
 0x52d   :  { %695 = vmax.xlane.f32.xlu0 %v694_v38 }
 0x53a   :  { %3465 = vrot.lane.b32.xlu1 %v3955_v43, %s3717_s17 }
 0x543   :  { %3470 = vrot.lane.b32.xlu0 %v3960_v56, %s3717_s17 }
 0x59a   :  { %v672_v39 = vpop.xlane.xlu0 %671 }
 0x59b   :  { %v697_v40 = vsub.f32 %v626_v53, %v672_v39 }
 0x59d   :  { %v706_v41 = vmul.f32 1.442695, %v697_v40 }
 0x59e   :  { %v675_v42 = vpop.xlane.xlu1 %674 }
 0x59f   :  { %3540 = vpow2.f32 %v706_v41  ;;  %v698_v44 = vsub.f32 %v631_v60, %v675_v42 }
 0x5a1   :  { %v708_v46 = vmul.f32 1.442695, %v698_v44 }
 0x5a2   :  { %v678_v47 = vpop.xlane.xlu0 %677 }
 0x5a3   :  { %3542 = vpow2.f32 %v708_v46  ;;  %v699_v48 = vsub.f32 %v636_v3, %v678_v47 }
 0x5a5   :  { %v710_v50 = vmul.f32 1.442695, %v699_v48 }
 0x5a6   :  { %v681_v51 = vpop.xlane.xlu0 %680 }
 0x5a7   :  { %3544 = vpow2.f32 %v710_v50  ;;  %v700_v52 = vsub.f32 %v641_v8, %v681_v51 }
 0x5a9   :  { %v4091_v54 = vpop.eup %3540  ;;  %v712_v43 = vmul.f32 1.442695, %v700_v52 }
 0x5aa   :  { %v684_v55 = vpop.xlane.xlu0 %683  ;;  %v724_v56 = vsel %vm669_vm11, %v4091_v54, 0.0 }
 0x5ab   :  { %3546 = vpow2.f32 %v712_v43  ;;  %v701_v53 = vsub.f32 %v646_v13, %v684_v55  ;;  %725 = vadd.xlane.f32.xlu1 %v724_v56 }
 0x5ad   :  { %v4095_v58 = vpop.eup %3542  ;;  %v714_v59 = vmul.f32 1.442695, %v701_v53 }
 0x5ae   :  { %v687_v60 = vpop.xlane.xlu1 %686  ;;  %v727_v61 = vsel %vm669_vm11, %v4095_v58, 0.0 }
 0x5af   :  { %3548 = vpow2.f32 %v714_v59  ;;  %v702_v63 = vsub.f32 %v651_v18, %v687_v60  ;;  %728 = vadd.xlane.f32.xlu0 %v727_v61 }
 0x5b1   :  { %v4099_v1 = vpop.eup %3544  ;;  %v716_v2 = vmul.f32 1.442695, %v702_v63 }
 0x5b2   :  { %v730_v3 = vsel %vm669_vm11, %v4099_v1, 0.0  ;;  %v690_v5 = vpop.xlane.xlu0 %689 }
 0x5b3   :  { %3550 = vpow2.f32 %v716_v2  ;;  %731 = vadd.xlane.f32.xlu1 %v730_v3  ;;  %v703_v24 = vsub.f32 %v4073_v27, %v690_v5 }
 0x5b5   :  { %v4103_v4 = vpop.eup %3546  ;;  %v718_v28 = vmul.f32 1.442695, %v703_v24 }
 0x5b6   :  { %v693_v6 = vpop.xlane.xlu1 %692  ;;  %v733_v7 = vsel %vm669_vm11, %v4103_v4, 0.0 }
 0x5b7   :  { %734 = vadd.xlane.f32.xlu1 %v733_v7  ;;  %v704_v26 = vsub.f32 %v4078_v31, %v693_v6  ;;  %3552 = vpow2.f32 %v718_v28 }
 0x5b9   :  { %v4107_v8 = vpop.eup %3548  ;;  %v720_v30 = vmul.f32 1.442695, %v704_v26 }
 0x5ba   :  { %v3466_v9 = vpop.permute.xlu1 %3465  ;;  %v696_v10 = vpop.xlane.xlu0 %695  ;;  %v736_v11 = vsel %vm669_vm11, %v4107_v8, 0.0 }
 0x5bb   :  { %v3468_v12 = vunpack.i.h.bf16 %v3466_v9  ;;  %v3467_v13 = vunpack.i.l.bf16 %v3466_v9  ;;  %737 = vadd.xlane.f32.xlu1 %v736_v11  ;;  %v705_v29 = vsub.f32 %v4083_v36, %v696_v10  ;;  %3554 = vpow2.f32 %v720_v30 }
 0x5bd   :  { %v4111_v14 = vpop.eup %3550  ;;  %v3268_v15 = vpack.c.bf16 %v3468_v12, %v3467_v13  ;;  %v722_v20 = vmul.f32 1.442695, %v705_v29  ;;  %v993_v13 = vld [vmem:[%s3771_s8] sm:$0xff] }
 0x5be   :  { %v3471_v16 = vpop.permute.xlu0 %3470  ;;  %v739_v17 = vsel %vm669_vm11, %v4111_v14, 0.0 }
 0x5bf   :  { %v3473_v18 = vunpack.i.h.bf16 %v3471_v16  ;;  %v3472_v21 = vunpack.i.l.bf16 %v3471_v16  ;;  %3269 = vmatpush3.bf16.msra.mxu0 %v3268_v15  ;;  %740 = vadd.xlane.f32.xlu0 %v739_v17  ;;  %3556 = vpow2.f32 %v722_v20  ;;  %v995_v15 = vld [vmem:[%s3771_s8 + $0x10] sm:$0xff] }
 0x5c0   :  { %3270 = vmatprep.subr.bf16.mxu0 %v3710_v45 }
 0x5c1   :  { %v3271_v23 = vpack.c.bf16 %v3473_v18, %v3472_v21  ;;  %v3553_v32 = vpop.eup %3552  ;;  %v996_v18 = vld [vmem:[%s3771_s8 + $0x18] sm:$0xff] }
 0x5c2   :  { %v3280_v26 = vpack.c.bf16 %v996_v18, %v995_v15 }
 0x5c3   :  { %3272 = vmatpush3.bf16.msra.mxu0 %v3271_v23 }
 0x5c4   :  { %3273 = vmatprep.subr.bf16.mxu0 %v3710_v45 }
 0x5c5   :  { %v4124_v33 = vpop.eup %3554 }
 0x5c9   :  { %v4127_v34 = vpop.eup %3556 }
 0x5ca   :  { %v748_v27 = vsel %vm669_vm11, %v4127_v34, 0.0 }
 0x5cc   :  { %785 = vrot.lane.b32.xlu1 %v3984_v0, %s3717_s17  ;;  %v742_v0 = vsel %vm669_vm11, %v3553_v32, 0.0 }
 0x5d5   :  { %3475 = vrot.lane.b32.xlu0 %v3974_v62, %s3717_s17  ;;  %v745_v62 = vsel %vm669_vm11, %v4124_v33, 0.0 }
 0x5f0   :  { %743 = vadd.xlane.f32.xlu1 %v742_v0 }
 0x5f4   :  { %746 = vadd.xlane.f32.xlu1 %v745_v62  ;;  %749 = vadd.xlane.f32.xlu0 %v748_v27 }
 0x638   :  { %v726_v31 = vpop.xlane.xlu1 %725 }
 0x639   :  { %3558 = vrcp.f32 %v726_v31 }
 0x63c   :  { %v729_v36 = vpop.xlane.xlu0 %728 }
 0x63d   :  { %3560 = vrcp.f32 %v729_v36 }
 0x640   :  { %v732_v35 = vpop.xlane.xlu1 %731 }
 0x641   :  { %3562 = vrcp.f32 %v732_v35 }
 0x643   :  { %v3559_v46 = vpop.eup %3558 }
 0x644   :  { %v735_v37 = vpop.xlane.xlu1 %734  ;;  %v760_v48 = vmul.f32 %v3559_v46, %v4091_v54 }
 0x645   :  { %3564 = vrcp.f32 %v735_v37 }
 0x647   :  { %v3561_v50 = vpop.eup %3560 }
 0x648   :  { %v738_v42 = vpop.xlane.xlu1 %737  ;;  %v761_v51 = vmul.f32 %v3561_v50, %v4095_v58 }
 0x649   :  { %3566 = vrcp.f32 %v738_v42 }
 0x64b   :  { %v3563_v52 = vpop.eup %3562 }
 0x64c   :  { %v741_v38 = vpop.xlane.xlu0 %740  ;;  %v786_v47 = vpop.permute.xlu1 %785  ;;  %v762_v54 = vmul.f32 %v3563_v52, %v4099_v1 }
 0x64d   :  { %3568 = vrcp.f32 %v741_v38 }
 0x64f   :  { %v3565_v43 = vpop.eup %3564 }
 0x650   :  { %v3476_v39 = vpop.permute.xlu0 %3475  ;;  %v763_v55 = vmul.f32 %v3565_v43, %v4103_v4 }
 0x651   :  { %v3478_v40 = vunpack.i.h.bf16 %v3476_v39  ;;  %v3477_v41 = vunpack.i.l.bf16 %v3476_v39 }
 0x653   :  { %v3274_v44 = vpack.c.bf16 %v3478_v40, %v3477_v41  ;;  %v3567_v56 = vpop.eup %3566 }
 0x654   :  { %v764_v53 = vmul.f32 %v3567_v56, %v4107_v8 }
 0x655   :  { %3275 = vmatpush3.bf16.msra.mxu0 %v3274_v44 }
 0x656   :  { %2948 = vmatprep.subr.mxu0 %v3712_v49 }
 0x657   :  { %v3569_v58 = vpop.eup %3568 }
 0x658   :  { %v765_v59 = vmul.f32 %v3569_v58, %v4111_v14  ;;  %v994_v14 = vld [vmem:[%s3771_s8 + $0x8] sm:$0xff]  ;;  %s4690_s8 = sld [smem:[#allocation5_spill]] }
 0x659   :  { %2949 = vmatpush3.msra.mxu0 %v786_v47  ;;  %v3277_v17 = vpack.c.bf16 %v994_v14, %v993_v13 }
 0x65a   :  { %2951 = vmatmul.mubr.msk.f32.vlgmr.msra.gmra.mrb[0].mxu0 %vm669_vm11, %v760_v48  ;;  %3276 = vmatprep.subr.bf16.mxu0 %v3710_v45 }
 0x65b   :  { %2953 = vmatprep.mubr.msk.f32.mxu0 %vm3711_vm6, %v3712_v49  ;;  %3278 = vmatpush3.bf16.msra.mxu0 %v3277_v17 }
 0x65c   :  { %3279 = vmatprep.subr.bf16.mxu0 %v3710_v45 }
 0x65e   :  { %2954 = vmatmul.mubr.msk.f32.gmra.mrb[2].mxu0 %vm669_vm11, %v761_v51 }
 0x65f   :  { %2956 = vmatprep.mubr.msk.f32.mxu0 %vm3711_vm6, %v3712_v49  ;;  %3281 = vmatpush3.bf16.msra.mxu0 %v3280_v26 }
 0x660   :  { %3282 = vmatprep.subr.bf16.mxu0 %v3710_v45 }
 0x662   :  { %2957 = vmatmul.mubr.msk.f32.gmra.mrb[4].mxu0 %vm669_vm11, %v762_v54 }
 0x663   :  { %2959 = vmatprep.mubr.msk.f32.mxu0 %vm3711_vm6, %v3712_v49 }
 0x666   :  { %2960 = vmatmul.mubr.msk.f32.gmra.mrb[6].mxu0 %vm669_vm11, %v763_v55 }
 0x667   :  { %2962 = vmatprep.mubr.msk.f32.mxu0 %vm3711_vm6, %v3712_v49 }
 0x66a   :  { %2963 = vmatmul.mubr.msk.f32.gmra.mrb[8].mxu0 %vm669_vm11, %v764_v53 }
 0x66b   :  { %2965 = vmatprep.mubr.msk.f32.mxu0 %vm3711_vm6, %v3712_v49 }
 0x66e   :  { %2966 = vmatmul.mubr.msk.f32.gmra.mrb[10].mxu0 %vm669_vm11, %v765_v59 }
 0x66f   :  { %2968 = vmatprep.mubr.msk.f32.mxu0 %vm3711_vm6, %v3712_v49 }
 0x67d   :  { %v744_v60 = vpop.xlane.xlu1 %743 }
 0x67e   :  { %3570 = vrcp.f32 %v744_v60 }
 0x681   :  { %v747_v61 = vpop.xlane.xlu1 %746  ;;  %v750_v63 = vpop.xlane.xlu0 %749 }
 0x682   :  { %3572 = vrcp.f32 %v747_v61 }
 0x683   :  { %3574 = vrcp.f32 %v750_v63 }
 0x688   :  { %v3571_v1 = vpop.eup %3570 }
 0x689   :  { %v766_v2 = vmul.f32 %v3571_v1, %v3553_v32 }
 0x68b   :  { %2969 = vmatmul.mubr.msk.f32.gmra.mrb[12].mxu0 %vm669_vm11, %v766_v2 }
 0x68c   :  { %v3573_v3 = vpop.eup %3572  ;;  %2971 = vmatprep.mubr.msk.f32.mxu0 %vm3711_vm6, %v3712_v49 }
 0x68d   :  { %v767_v4 = vmul.f32 %v3573_v3, %v4124_v33  ;;  %v3575_v5 = vpop.eup %3574 }
 0x68e   :  { %v768_v6 = vmul.f32 %v3575_v5, %v4127_v34 }
 0x68f   :  { %2972 = vmatmul.mubr.msk.f32.gmra.mrb[14].mxu0 %vm669_vm11, %v767_v4 }
 0x690   :  { %2974 = vmatprep.mubr.msk.f32.mxu0 %vm3711_vm6, %v3712_v49 }
 0x693   :  { %2975 = vmatmul.mubr.msk.f32.gmra.mrb[16].mxu0 %vm669_vm11, %v768_v6  ;;  %v2642_v6 = vld [vmem:[%s3776_s14] ss:$0 sm:$0xff]  ;;  %s4691_s14 = sld [smem:[#allocation6_spill]] }
 0x694   :  { %2985 = vmatprep.mubr.msk.f32.mxu0 %vm3711_vm6, %v3712_v49 }
 0x72d   :  { %v889_v7 = vpop.f32.mrb[0].mxu0 }
 0x72e   :  { %v2952_v8 = vpop.f32.mrb[1].mxu0 }
 0x731   :  { %v4170_v9 = vpop.f32.mrb[2].mxu0 }
 0x732   :  { %v2955_v10 = vpop.f32.mrb[3].mxu0 }
 0x735   :  { %v4172_v11 = vpop.f32.mrb[4].mxu0 }
 0x736   :  { %v2958_v12 = vpop.f32.mrb[5].mxu0  ;;  %v936_v21 = vrot.slane %v4172_v11, 2 }
 0x739   :  { %v904_v16 = vpop.f32.mrb[6].mxu0 }
 0x73a   :  { %v937_v23 = vrot.slane %v904_v16, 2  ;;  %v2961_v24 = vpop.f32.mrb[7].mxu0 }
 0x73c   :  { %v938_v28 = vsel %vm438_vm7, %v936_v21, %v937_v23 }
 0x73d   :  { %941 = vrot.lane.b32.xlu0 %v938_v28, %s3718_s25  ;;  %v909_v29 = vpop.f32.mrb[8].mxu0 }
 0x73e   :  { %v939_v30 = vrot.slane %v909_v29, 2  ;;  %v2964_v20 = vpop.f32.mrb[9].mxu0  ;;  %v952_v0 = vrot.slane %v909_v29, 4 }
 0x740   :  { %v940_v32 = vsel %vm438_vm7, %v937_v23, %v939_v30 }
 0x741   :  { %943 = vrot.lane.b32.xlu0 %v940_v32, %s3718_s25  ;;  %v914_v33 = vpop.f32.mrb[10].mxu0 }
 0x742   :  { %v953_v34 = vrot.slane %v914_v33, 4  ;;  %v2967_v62 = vpop.f32.mrb[11].mxu0 }
 0x744   :  { %v954_v27 = vsel %vm424_vm8, %v952_v0, %v953_v34 }
 0x745   :  { %957 = vrot.lane.b32.xlu1 %v954_v27, %s3719_s29 }
 0x75e   :  { %v919_v31 = vpop.f32.mrb[12].mxu0 }
 0x75f   :  { %v955_v35 = vrot.slane %v919_v31, 4  ;;  %v2970_v36 = vpop.f32.mrb[13].mxu0  ;;  %v968_v39 = vrot.slane %v919_v31, 6 }
 0x760   :  { %v1156_v36 = vld [vmem:[%s3791_s30 + $0x8] sm:$0xff] }
 0x761   :  { %v956_v37 = vsel %vm424_vm8, %v953_v34, %v955_v35 }
 0x762   :  { %v924_v38 = vpop.f32.mrb[14].mxu0 }
 0x763   :  { %v969_v40 = vrot.slane %v924_v38, 6  ;;  %v2973_v41 = vpop.f32.mrb[15].mxu0  ;;  %v1157_v38 = vld [vmem:[%s3791_s30 + $0x10] sm:$0xff] }
 0x764   :  { %v1270_v41 = vld [vmem:[%s3801_s12] sm:$0xff] }
 0x765   :  { %v970_v42 = vsel %vm239_vm5, %v968_v39, %v969_v40  ;;  %v1158_v39 = vld [vmem:[%s3791_s30 + $0x18] sm:$0xff] }
 0x766   :  { %973 = vrot.lane.b32.xlu1 %v970_v42, %s3720_s3  ;;  %v929_v44 = vpop.f32.mrb[16].mxu0  ;;  %v1271_v42 = vld [vmem:[%s3801_s12 + $0x8] sm:$0xff] }
 0x767   :  { %v971_v46 = vrot.slane %v929_v44, 6  ;;  %v2976_v47 = vpop.f32.mrb[17].mxu0  ;;  %v1272_v44 = vld [vmem:[%s3801_s12 + $0x10] sm:$0xff] }
 0x768   :  { %v1273_v47 = vld [vmem:[%s3801_s12 + $0x18] sm:$0xff] }
 0x769   :  { %v972_v48 = vsel %vm239_vm5, %v969_v40, %v971_v46  ;;  %v3286_v40 = vpack.c.bf16 %v1158_v39, %v1157_v38 }
 0x76a   :  { %959 = vrot.lane.b32.xlu1 %v956_v37, %s3719_s29  ;;  %975 = vrot.lane.b32.xlu0 %v972_v48, %s3720_s3  ;;  %v3292_v48 = vpack.c.bf16 %v1273_v47, %v1272_v44 }
 0x76e   :  { %945 = vrot.lane.b32.xlu1 %v939_v30, %s3718_s25  ;;  %961 = vrot.lane.b32.xlu0 %v955_v35, %s3719_s29  ;;  %v1155_v35 = vld [vmem:[%s3791_s30] sm:$0xff]  ;;  %s4694_s30 = sld [smem:[#allocation8_spill]] }
 0x76f   :  { %v3283_v37 = vpack.c.bf16 %v1156_v36, %v1155_v35 }
 0x772   :  { %977 = vrot.lane.b32.xlu1 %v971_v46, %s3720_s3  ;;  %v3289_v46 = vpack.c.bf16 %v1271_v42, %v1270_v41 }
 0x774   :  { %3290 = vmatpush3.bf16.msra.mxu1 %v3289_v46 }
 0x775   :  { %3291 = vmatprep.subr.bf16.mxu1 %v3710_v45 }
 0x778   :  { %3293 = vmatpush3.bf16.msra.mxu1 %v3292_v48 }
 0x779   :  { %3294 = vmatprep.subr.bf16.mxu1 %v3710_v45 }
 0x7af   :  { %v942_v50 = vpop.permute.xlu0 %941 }
 0x7b0   :  { %v982_v52 = vsel %vm519_vm9, %v889_v7, %v942_v50  ;;  %v1274_v50 = vld [vmem:[%s3801_s12 + $0x20] sm:$0xff] }
 0x7b3   :  { %v944_v54 = vpop.permute.xlu0 %943 }
 0x7b4   :  { %v983_v53 = vsel %vm519_vm9, %v4170_v9, %v944_v54 }
 0x7b7   :  { %v958_v51 = vpop.permute.xlu1 %957 }
 0x7b8   :  { %v986_v43 = vsel %vm985_vm12, %v982_v52, %v958_v51  ;;  %v1275_v51 = vld [vmem:[%s3801_s12 + $0x28] sm:$0xff] }
 0x7b9   :  { %v3295_v52 = vpack.c.bf16 %v1275_v51, %v1274_v50 }
 0x7bb   :  { %3296 = vmatpush3.bf16.msra.mxu1 %v3295_v52 }
 0x7bc   :  { %3297 = vmatprep.subr.bf16.mxu1 %v3710_v45 }
 0x7d8   :  { %v974_v55 = vpop.permute.xlu1 %973 }
 0x7d9   :  { %v990_v56 = vsel %vm989_vm13, %v986_v43, %v974_v55 }
 0x7da   :  { %2986 = vmatmul.mubr.msk.f32.vlgmr.msra.gmra.mrb[18].mxu0 %vm252_vm4, %v990_v56 }
 0x7db   :  { %2988 = vmatprep.mubr.msk.f32.mxu0 %vm3711_vm6, %v3712_v49  ;;  %3284 = vmatpush3.bf16.msra.mxu0 %v3283_v37 }
 0x7dc   :  { %v960_v58 = vpop.permute.xlu1 %959  ;;  %v976_v59 = vpop.permute.xlu0 %975  ;;  %3285 = vmatprep.subr.bf16.mxu0 %v3710_v45 }
 0x7dd   :  { %v987_v60 = vsel %vm985_vm12, %v983_v53, %v960_v58 }
 0x7de   :  { %v991_v61 = vsel %vm989_vm13, %v987_v60, %v976_v59 }
 0x7df   :  { %2989 = vmatmul.mubr.msk.f32.gmra.mrb[20].mxu0 %vm252_vm4, %v991_v61 }
 0x7e0   :  { %v946_v63 = vpop.permute.xlu1 %945  ;;  %2991 = vmatprep.mubr.msk.f32.mxu0 %vm3711_vm6, %v3712_v49  ;;  %v962_v2 = vpop.permute.xlu0 %961  ;;  %3287 = vmatpush3.bf16.msra.mxu0 %v3286_v40 }
 0x7e1   :  { %v984_v1 = vsel %vm519_vm9, %v4172_v11, %v946_v63  ;;  %3312 = vmatprep.subr.bf16.mxu0 %v3710_v45  ;;  %v2646_v63 = vld [vmem:[%s3781_s19] ss:$0 sm:$0xff]  ;;  %s4692_s19 = sld [smem:[#allocation9_spill]] }
 0x7e2   :  { %v988_v3 = vsel %vm985_vm12, %v984_v1, %v962_v2 }
 0x7e4   :  { %v978_v4 = vpop.permute.xlu1 %977 }
 0x7e5   :  { %v992_v5 = vsel %vm989_vm13, %v988_v3, %v978_v4  ;;  %v2647_v3 = vld [vmem:[%s3786_s24] ss:$0 sm:$0xff]  ;;  %s4693_s24 = sld [smem:[#allocation7_spill]] }
 0x7e6   :  { %2992 = vmatmul.mubr.msk.f32.gmra.mrb[22].mxu0 %vm252_vm4, %v992_v5 }
 0x7e7   :  { %3002 = vmatprep.mubr.msk.f32.mxu0 %vm3711_vm6, %v3712_v49 }
 0x8ad   :  { %v1079_v7 = vpop.f32.mrb[18].mxu0 }
 0x8ae   :  { %v1080_v8 = vadd.f32 %v2642_v6, %v1079_v7  ;;  %v2987_v9 = vpop.f32.mrb[19].mxu0 }
 0x8b0   :  { %v4218_v10 = vadd.f32 %v1080_v8, %v3893_v22 }
 0x8b2   :  { %v1084_v12 = vpop.f32.mrb[20].mxu0  ;;  %v1098_v11 = vsel %vm252_vm4, %v4218_v10, 0.0 }
 0x8b3   :  { %v1085_v13 = vadd.f32 %v2642_v6, %v1084_v12  ;;  %1099 = vadd.xlane.f32.xlu0 %v1098_v11  ;;  %v2990_v14 = vpop.f32.mrb[21].mxu0 }
 0x8b5   :  { %v4223_v15 = vadd.f32 %v1085_v13, %v3899_v25 }
 0x8b7   :  { %v1101_v16 = vsel %vm252_vm4, %v4223_v15, 0.0 }
 0x8b8   :  { %1102 = vadd.xlane.f32.xlu1 %v1101_v16  ;;  %v1276_v16 = vld [vmem:[%s3801_s12 + $0x30] sm:$0xff] }
 0x8b9   :  { %v1089_v17 = vpop.f32.mrb[22].mxu0 }
 0x8ba   :  { %v1090_v18 = vadd.f32 %v2642_v6, %v1089_v17  ;;  %v2993_v21 = vpop.f32.mrb[23].mxu0  ;;  %v1277_v17 = vld [vmem:[%s3801_s12 + $0x38] sm:$0xff] }
 0x8bb   :  { %v1278_v21 = vld [vmem:[%s3801_s12 + $0x40] sm:$0xff] }
 0x8bc   :  { %v4228_v22 = vadd.f32 %v1090_v18, %v3889_v19  ;;  %v3298_v18 = vpack.c.bf16 %v1277_v17, %v1276_v16 }
 0x8be   :  { %v1104_v23 = vsel %vm259_vm2, %v4228_v22, 0.0  ;;  %3299 = vmatpush3.bf16.msra.mxu1 %v3298_v18 }
 0x8bf   :  { %1105 = vadd.xlane.f32.xlu0 %v1104_v23  ;;  %3300 = vmatprep.subr.bf16.mxu1 %v3710_v45  ;;  %v1279_v23 = vld [vmem:[%s3801_s12 + $0x48] sm:$0xff] }
 0x940   :  { %v1100_v24 = vpop.xlane.xlu0 %1099 }
 0x941   :  { %v1107_v26 = vmul.f32 0.03125, %v1100_v24  ;;  %v3301_v24 = vpack.c.bf16 %v1279_v23, %v1278_v21 }
 0x943   :  { %v1110_v28 = vsub.f32 %v4218_v10, %v1107_v26  ;;  %3302 = vmatpush3.bf16.msra.mxu1 %v3301_v24  ;;  %v1280_v26 = vld [vmem:[%s3801_s12 + $0x50] sm:$0xff] }
 0x944   :  { %3303 = vmatprep.subr.bf16.mxu1 %v3710_v45 }
 0x945   :  { %v1103_v25 = vpop.xlane.xlu1 %1102  ;;  %v1113_v29 = vmul.f32 %v1110_v28, %v1110_v28 }
 0x946   :  { %v1108_v30 = vmul.f32 0.03125, %v1103_v25 }
 0x947   :  { %v1116_v20 = vsel %vm252_vm4, %v1113_v29, 0.0  ;;  %v1282_v29 = vld [vmem:[%s3801_s12 + $0x60] sm:$0xff] }
 0x948   :  { %v1111_v32 = vsub.f32 %v4223_v15, %v1108_v30  ;;  %1117 = vadd.xlane.f32.xlu0 %v1116_v20  ;;  %v1283_v30 = vld [vmem:[%s3801_s12 + $0x68] sm:$0xff] }
 0x949   :  { %v3307_v20 = vpack.c.bf16 %v1283_v30, %v1282_v29  ;;  %v1438_v30 = vld [vmem:[%s4692_s19] sm:$0xff] }
 0x94a   :  { %v1114_v19 = vmul.f32 %v1111_v32, %v1111_v32 }
 0x94c   :  { %v1106_v33 = vpop.xlane.xlu0 %1105  ;;  %v1119_v0 = vsel %vm252_vm4, %v1114_v19, 0.0  ;;  %v1285_v19 = vld [vmem:[%s3801_s12 + $0x78] sm:$0xff] }
 0x94d   :  { %v1109_v34 = vmul.f32 0.03125, %v1106_v33  ;;  %1120 = vadd.xlane.f32.xlu0 %v1119_v0  ;;  %v2648_v0 = vld [vmem:[%s4690_s8] ss:$0 sm:$0xff] }
 0x94f   :  { %v1112_v62 = vsub.f32 %v4228_v22, %v1109_v34 }
 0x951   :  { %v1115_v27 = vmul.f32 %v1112_v62, %v1112_v62 }
 0x953   :  { %v1122_v31 = vsel %vm259_vm2, %v1115_v27, 0.0 }
 0x954   :  { %1123 = vadd.xlane.f32.xlu1 %v1122_v31 }
 0x9d5   :  { %v1118_v54 = vpop.xlane.xlu0 %1117 }
 0x9d6   :  { %v1125_v43 = vmul.f32 0.03125, %v1118_v54 }
 0x9d8   :  { %v1128_v55 = vadd.f32 1e-05, %v1125_v43 }
 0x9da   :  { %3576 = vrsqrt.f32 %v1128_v55  ;;  %v1121_v56 = vpop.xlane.xlu0 %1120 }
 0x9db   :  { %v1126_v53 = vmul.f32 0.03125, %v1121_v56 }
 0x9dd   :  { %v1129_v58 = vadd.f32 1e-05, %v1126_v53 }
 0x9df   :  { %3578 = vrsqrt.f32 %v1129_v58 }
 0x9e1   :  { %v1124_v59 = vpop.xlane.xlu1 %1123 }
 0x9e2   :  { %v1127_v60 = vmul.f32 0.03125, %v1124_v59  ;;  %v2652_v59 = vld [vmem:[%s4691_s14] ss:$0 sm:$0xff] }
 0x9e4   :  { %v3577_v61 = vpop.eup %3576  ;;  %v1130_v1 = vadd.f32 1e-05, %v1127_v60 }
 0x9e5   :  { %v1134_v2 = vmul.f32 %v3577_v61, %v1110_v28  ;;  %v1281_v28 = vld [vmem:[%s3801_s12 + $0x58] sm:$0xff] }
 0x9e6   :  { %3580 = vrsqrt.f32 %v1130_v1  ;;  %v3304_v25 = vpack.c.bf16 %v1281_v28, %v1280_v26 }
 0x9e7   :  { %v1143_v4 = vmul.f32 %v2646_v63, %v1134_v2 }
 0x9e8   :  { %3305 = vmatpush3.bf16.msra.mxu1 %v3304_v25 }
 0x9e9   :  { %v3579_v5 = vpop.eup %3578  ;;  %v1152_v6 = vadd.f32 %v2647_v3, %v1143_v4  ;;  %3306 = vmatprep.subr.bf16.mxu1 %v3710_v45 }
 0x9ea   :  { %v1135_v7 = vmul.f32 %v3579_v5, %v1111_v32  ;;  %v1284_v32 = vld [vmem:[%s3801_s12 + $0x70] sm:$0xff]  ;;  %s4696_s12 = sld [smem:[#allocation11_spill]] }
 0x9eb   :  { %3003 = vmatmul.mubr.msk.f32.vlgmr.msra.gmra.mrb[24].mxu0 %vm252_vm4, %v1152_v6  ;;  %v3310_v33 = vpack.c.bf16 %v1285_v19, %v1284_v32  ;;  %v1440_v19 = vld [vmem:[%s4692_s19 + $0x10] sm:$0xff] }
 0x9ec   :  { %3005 = vmatprep.mubr.msk.f32.mxu0 %vm3711_vm6, %v3712_v49  ;;  %v1144_v8 = vmul.f32 %v2646_v63, %v1135_v7  ;;  %3308 = vmatpush3.bf16.msra.mxu1 %v3307_v20  ;;  %v1439_v20 = vld [vmem:[%s4692_s19 + $0x8] sm:$0xff] }
 0x9ed   :  { %3309 = vmatprep.subr.bf16.mxu1 %v3710_v45  ;;  %v3313_v32 = vpack.c.bf16 %v1439_v20, %v1438_v30 }
 0x9ee   :  { %v1153_v9 = vadd.f32 %v2647_v3, %v1144_v8 }
 0x9ef   :  { %3314 = vmatpush3.bf16.msra.mxu0 %v3313_v32 }
 0x9f0   :  { %v3581_v12 = vpop.eup %3580  ;;  %3006 = vmatmul.mubr.msk.f32.gmra.mrb[26].mxu0 %vm252_vm4, %v1153_v9  ;;  %3311 = vmatpush3.bf16.msra.mxu1 %v3310_v33  ;;  %v1441_v33 = vld [vmem:[%s4692_s19 + $0x18] sm:$0xff] }
 0x9f1   :  { %3008 = vmatprep.mubr.msk.f32.mxu0 %vm3711_vm6, %v3712_v49  ;;  %v1136_v11 = vmul.f32 %v3581_v12, %v1112_v62  ;;  %3318 = vmatprep.subr.bf16.mxu1 %v3710_v45 }
 0x9f2   :  { %3315 = vmatprep.subr.bf16.mxu0 %v3710_v45 }
 0x9f3   :  { %v1145_v13 = vmul.f32 %v2646_v63, %v1136_v11 }
 0x9f5   :  { %v1154_v14 = vadd.f32 %v2647_v3, %v1145_v13 }
 0x9f7   :  { %3009 = vmatmul.mubr.msk.f32.gmra.mrb[28].mxu0 %vm252_vm4, %v1154_v14 }
 0x9f8   :  { %3060 = vmatprep.mubr.msk.f32.mxu0 %vm3711_vm6, %v3712_v49 }
 0xabe   :  { %v1241_v34 = vpop.f32.mrb[24].mxu0 }
 0xabf   :  { %v1242_v62 = vadd.f32 %v2648_v0, %v1241_v34  ;;  %v3004_v27 = vpop.f32.mrb[25].mxu0 }
 0xac1   :  { %v1258_v31 = vmul.f32 0.70710677, %v1242_v62  ;;  %v1255_v46 = vmul.f32 0.5, %v1242_v62 }
 0xac3   :  { %3582 = verf.f32 %v1258_v31  ;;  %v1246_v35 = vpop.f32.mrb[26].mxu0 }
 0xac4   :  { %v1247_v36 = vadd.f32 %v2648_v0, %v1246_v35  ;;  %v3007_v37 = vpop.f32.mrb[27].mxu0 }
 0xac6   :  { %v1259_v38 = vmul.f32 0.70710677, %v1247_v36  ;;  %v1256_v51 = vmul.f32 0.5, %v1247_v36 }
 0xac8   :  { %3584 = verf.f32 %v1259_v38 }
 0xaca   :  { %v1251_v39 = vpop.f32.mrb[28].mxu0 }
 0xacb   :  { %v1252_v40 = vadd.f32 %v2648_v0, %v1251_v39  ;;  %v3010_v41 = vpop.f32.mrb[29].mxu0  ;;  %v3316_v0 = vpack.c.bf16 %v1441_v33, %v1440_v19 }
 0xacd   :  { %v3583_v42 = vpop.eup %3582  ;;  %v1260_v44 = vmul.f32 0.70710677, %v1252_v40  ;;  %v1257_v55 = vmul.f32 0.5, %v1252_v40  ;;  %3317 = vmatpush3.bf16.msra.mxu0 %v3316_v0  ;;  %v2653_v40 = vld [vmem:[%s4693_s24] ss:$0 sm:$0xff] }
 0xace   :  { %v1264_v47 = vadd.f32 1.0, %v3583_v42  ;;  %3334 = vmatprep.subr.bf16.mxu0 %v3710_v45 }
 0xacf   :  { %3586 = verf.f32 %v1260_v44  ;;  %v2654_v44 = vld [vmem:[%s4694_s30] ss:$0 sm:$0xff] }
 0xad0   :  { %v1267_v48 = vmul.f32 %v1264_v47, %v1255_v46 }
 0xad2   :  { %v3585_v50 = vpop.eup %3584  ;;  %3044 = vmatmul.mubr.f32.vlgmr.msra.gmra.mrb[26].mxu1 %v1267_v48 }
 0xad3   :  { %v1265_v52 = vadd.f32 1.0, %v3585_v50  ;;  %3046 = vmatprep.mubr.msk.f32.mxu1 %vm3711_vm6, %v3712_v49 }
 0xad5   :  { %v1268_v54 = vmul.f32 %v1265_v52, %v1256_v51 }
 0xad7   :  { %3047 = vmatmul.mubr.f32.gmra.mrb[28].mxu1 %v1268_v54 }
 0xad8   :  { %3049 = vmatprep.mubr.msk.f32.mxu1 %vm3711_vm6, %v3712_v49 }
 0xad9   :  { %v3587_v43 = vpop.eup %3586 }
 0xada   :  { %v1266_v56 = vadd.f32 1.0, %v3587_v43 }
 0xadc   :  { %v1269_v53 = vmul.f32 %v1266_v56, %v1257_v55 }
 0xade   :  { %3050 = vmatmul.mubr.f32.gmra.mrb[30].mxu1 %v1269_v53 }
 0xadf   :  { %3087 = vmatprep.mubr.msk.f32.mxu1 %vm3711_vm6, %v3712_v49 }
 0xba5   :  { %v1352_v58 = vpop.f32.mrb[26].mxu1 }
 0xba6   :  { %v1366_v60 = vadd.f32 %v1352_v58, %v4218_v10  ;;  %v3045_v61 = vpop.f32.mrb[27].mxu1 }
 0xba8   :  { %v4288_v63 = vadd.f32 %v2652_v59, %v1366_v60 }
 0xbaa   :  { %v1357_v1 = vpop.f32.mrb[28].mxu1  ;;  %v1381_v2 = vsel %vm252_vm4, %v4288_v63, 0.0 }
 0xbab   :  { %v1367_v3 = vadd.f32 %v1357_v1, %v4223_v15  ;;  %1382 = vadd.xlane.f32.xlu0 %v1381_v2  ;;  %v3048_v4 = vpop.f32.mrb[29].mxu1 }
 0xbad   :  { %v4293_v5 = vadd.f32 %v2652_v59, %v1367_v3 }
 0xbaf   :  { %v1384_v6 = vsel %vm252_vm4, %v4293_v5, 0.0 }
 0xbb0   :  { %1385 = vadd.xlane.f32.xlu1 %v1384_v6 }
 0xbb1   :  { %v1362_v7 = vpop.f32.mrb[30].mxu1 }
 0xbb2   :  { %v1368_v10 = vadd.f32 %v1362_v7, %v4228_v22  ;;  %v3051_v8 = vpop.f32.mrb[31].mxu1 }
 0xbb4   :  { %v4298_v9 = vadd.f32 %v2652_v59, %v1368_v10 }
 0xbb6   :  { %v1387_v12 = vsel %vm259_vm2, %v4298_v9, 0.0 }
 0xbb7   :  { %1388 = vadd.xlane.f32.xlu0 %v1387_v12 }
 0xc38   :  { %v1383_v11 = vpop.xlane.xlu0 %1382 }
 0xc39   :  { %v1390_v15 = vmul.f32 0.03125, %v1383_v11 }
 0xc3b   :  { %v1393_v13 = vsub.f32 %v4288_v63, %v1390_v15 }
 0xc3d   :  { %v1386_v14 = vpop.xlane.xlu1 %1385  ;;  %v1396_v16 = vmul.f32 %v1393_v13, %v1393_v13 }
 0xc3e   :  { %v1391_v17 = vmul.f32 0.03125, %v1386_v14 }
 0xc3f   :  { %v1399_v18 = vsel %vm252_vm4, %v1396_v16, 0.0 }
 0xc40   :  { %v1394_v22 = vsub.f32 %v4293_v5, %v1391_v17  ;;  %1400 = vadd.xlane.f32.xlu1 %v1399_v18 }
 0xc42   :  { %v1397_v21 = vmul.f32 %v1394_v22, %v1394_v22 }
 0xc44   :  { %v1389_v23 = vpop.xlane.xlu0 %1388  ;;  %v1402_v24 = vsel %vm252_vm4, %v1397_v21, 0.0 }
 0xc45   :  { %v1392_v26 = vmul.f32 0.03125, %v1389_v23  ;;  %1403 = vadd.xlane.f32.xlu0 %v1402_v24 }
 0xc47   :  { %v1395_v28 = vsub.f32 %v4298_v9, %v1392_v26 }
 0xc49   :  { %v1398_v25 = vmul.f32 %v1395_v28, %v1395_v28 }
 0xc4b   :  { %v1405_v29 = vsel %vm259_vm2, %v1398_v25, 0.0 }
 0xc4c   :  { %1406 = vadd.xlane.f32.xlu1 %v1405_v29 }
 0xccd   :  { %v1401_v34 = vpop.xlane.xlu1 %1400 }
 0xcce   :  { %v1408_v62 = vmul.f32 0.03125, %v1401_v34 }
 0xcd0   :  { %v1411_v27 = vadd.f32 1e-05, %v1408_v62 }
 0xcd2   :  { %3588 = vrsqrt.f32 %v1411_v27  ;;  %v1404_v31 = vpop.xlane.xlu0 %1403 }
 0xcd3   :  { %v1409_v35 = vmul.f32 0.03125, %v1404_v31 }
 0xcd5   :  { %v1412_v36 = vadd.f32 1e-05, %v1409_v35 }
 0xcd7   :  { %3590 = vrsqrt.f32 %v1412_v36 }
 0xcd9   :  { %v1407_v37 = vpop.xlane.xlu1 %1406 }
 0xcda   :  { %v1410_v38 = vmul.f32 0.03125, %v1407_v37 }
 0xcdc   :  { %v3589_v39 = vpop.eup %3588  ;;  %v1413_v41 = vadd.f32 1e-05, %v1410_v38 }
 0xcdd   :  { %v1417_v42 = vmul.f32 %v3589_v39, %v1393_v13 }
 0xcde   :  { %3592 = vrsqrt.f32 %v1413_v41 }
 0xcdf   :  { %v1426_v46 = vmul.f32 %v2653_v40, %v1417_v42 }
 0xce1   :  { %v3591_v47 = vpop.eup %3590  ;;  %v1435_v48 = vadd.f32 %v2654_v44, %v1426_v46 }
 0xce2   :  { %v1418_v50 = vmul.f32 %v3591_v47, %v1394_v22 }
 0xce3   :  { %3061 = vmatmul.mubr.msk.f32.vlgmr.msra.gmra.mrb[30].mxu0 %vm252_vm4, %v1435_v48 }
 0xce4   :  { %3063 = vmatprep.mubr.msk.f32.mxu0 %vm3711_vm6, %v3712_v49  ;;  %v1427_v51 = vmul.f32 %v2653_v40, %v1418_v50 }
 0xce6   :  { %v1436_v52 = vadd.f32 %v2654_v44, %v1427_v51 }
 0xce8   :  { %v3593_v54 = vpop.eup %3592  ;;  %3064 = vmatmul.mubr.msk.f32.gmra.mrb[32].mxu0 %vm252_vm4, %v1436_v52 }
 0xce9   :  { %3066 = vmatprep.mubr.msk.f32.mxu0 %vm3711_vm6, %v3712_v49  ;;  %v1419_v43 = vmul.f32 %v3593_v54, %v1395_v28 }
 0xceb   :  { %v1428_v55 = vmul.f32 %v2653_v40, %v1419_v43 }
 0xced   :  { %v1437_v56 = vadd.f32 %v2654_v44, %v1428_v55 }
 0xcef   :  { %3067 = vmatmul.mubr.msk.f32.gmra.mrb[34].mxu0 %vm252_vm4, %v1437_v56 }
 0xcf0   :  { %3132 = vmatprep.mubr.msk.f32.mxu0 %vm3711_vm6, %v3712_v49 }
 0xdb6   :  { %v1517_v53 = vpop.f32.mrb[30].mxu0 }
 0xdb7   :  { %v3062_v58 = vpop.f32.mrb[31].mxu0  ;;  %v1581_v60 = vrot.slane %v1517_v53, 6  ;;  %v1607_v2 = vrot.slane %v1517_v53, 2  ;;  %v1594_v6 = vrot.slane %v1517_v53, 4  ;;  %v1531_v42 = vmul.f32 0.35355338, %v1517_v53 }
 0xdb9   :  { %v1537_v50 = vrot.slane %v1531_v42, 6  ;;  %v1550_v55 = vrot.slane %v1531_v42, 4 }
 0xdbb   :  { %v1522_v59 = vpop.f32.mrb[32].mxu0 }
 0xdbc   :  { %v3065_v61 = vpop.f32.mrb[33].mxu0  ;;  %v1582_v1 = vrot.slane %v1522_v59, 6  ;;  %v1608_v3 = vrot.slane %v1522_v59, 2  ;;  %v4325_v4 = vpack.i.bf16 %v1522_v59, %v1517_v53  ;;  %v1595_v7 = vrot.slane %v1522_v59, 4 }
 0xdbd   :  { %v4351_v40 = vmul.f32 0.35355338, %v1522_v59 }
 0xdbe   :  { %v1583_v10 = vsel %vm239_vm5, %v1581_v60, %v1582_v1  ;;  %v1609_v8 = vsel %vm438_vm7, %v1607_v2, %v1608_v3  ;;  %v1596_v15 = vsel %vm424_vm8, %v1594_v6, %v1595_v7 }
 0xdbf   :  { %v3479_v12 = vpack.i.bf16 %v1583_v10, %v1581_v60  ;;  %v3489_v11 = vpack.i.bf16 %v1609_v8, %v1607_v2  ;;  %v3484_v13 = vpack.i.bf16 %v1596_v15, %v1594_v6  ;;  %v1538_v48 = vrot.slane %v4351_v40, 6 }
 0xdc0   :  { %v1551_v43 = vrot.slane %v4351_v40, 4  ;;  %v1564_v59 = vrot.slane %v4351_v40, 2  ;;  %v1563_v60 = vrot.slane %v1531_v42, 2 }
 0xdc1   :  { %3480 = vrot.lane.b32.xlu0 %v3479_v12, %s3713_s0  ;;  %v1539_v52 = vsel %vm239_vm5, %v1537_v50, %v1538_v48 }
 0xdc2   :  { %v1527_v14 = vpop.f32.mrb[34].mxu0  ;;  %v1552_v53 = vsel %vm424_vm8, %v1550_v55, %v1551_v43 }
 0xdc3   :  { %v3068_v16 = vpop.f32.mrb[35].mxu0  ;;  %v1584_v17 = vrot.slane %v1527_v14, 6  ;;  %v1597_v18 = vrot.slane %v1527_v14, 4  ;;  %v1610_v22 = vrot.slane %v1527_v14, 2  ;;  %v4359_v46 = vmul.f32 0.35355338, %v1527_v14 }
 0xdc5   :  { %3490 = vrot.lane.b32.xlu0 %v3489_v11, %s3714_s5  ;;  %v1585_v21 = vsel %vm239_vm5, %v1582_v1, %v1584_v17  ;;  %v1598_v23 = vsel %vm424_vm8, %v1595_v7, %v1597_v18  ;;  %v1611_v24 = vsel %vm438_vm7, %v1608_v3, %v1610_v22  ;;  %v1540_v51 = vrot.slane %v4359_v46, 6 }
 0xdc6   :  { %1590 = vrot.lane.b32.xlu1 %v1585_v21, %s3713_s0  ;;  %v1553_v56 = vrot.slane %v4359_v46, 4  ;;  %v1566_v61 = vrot.slane %v4359_v46, 2  ;;  %v1565_v1 = vsel %vm438_vm7, %v1563_v60, %v1564_v59 }
 0xdc7   :  { %v1541_v54 = vsel %vm239_vm5, %v1538_v48, %v1540_v51  ;;  %v3650_v48 = vld [vmem:[%s3751_s21 + $0x10] sm:$0xff] }
 0xdc8   :  { %v1554_v58 = vsel %vm424_vm8, %v1551_v43, %v1553_v56  ;;  %v1567_v2 = vsel %vm438_vm7, %v1564_v59, %v1566_v61  ;;  %v3651_v43 = vld [vmem:[%s3751_s21 + $0x18] sm:$0xff]  ;;  %v3652_v59 = vld [vmem:[%s3751_s21 + $0x20] sm:$0xff] }
 0xdc9   :  { %3495 = vrot.lane.b32.xlu0 %v4325_v4, %s3716_s13 }
 0xdca   :  { %3485 = vrot.lane.b32.xlu1 %v3484_v13, %s3715_s9 }
 0xdce   :  { %1603 = vrot.lane.b32.xlu1 %v1598_v23, %s3715_s9 }
 0xdd2   :  { %1616 = vrot.lane.b32.xlu1 %v1611_v24, %s3714_s5 }
 0xe33   :  { %v3481_v26 = vpop.permute.xlu0 %3480 }
 0xe34   :  { %v3483_v28 = vunpack.i.h.bf16 %v3481_v26  ;;  %v3482_v25 = vunpack.i.l.bf16 %v3481_v26 }
 0xe36   :  { %v1619_v29 = vsel %vm239_vm5, %v1527_v14, %v3482_v25 }
 0xe37   :  { %v4342_v30 = vpack.i.bf16 %v3483_v28, %v1619_v29  ;;  %v3491_v20 = vpop.permute.xlu0 %3490 }
 0xe38   :  { %v1591_v32 = vpop.permute.xlu1 %1590  ;;  %v3492_v35 = vunpack.i.l.bf16 %v3491_v20  ;;  %v3493_v37 = vunpack.i.h.bf16 %v3491_v20 }
 0xe39   :  { %3500 = vrot.lane.b32.xlu1 %v4342_v30, %s3716_s13 }
 0xe3b   :  { %v3496_v19 = vpop.permute.xlu0 %3495 }
 0xe3c   :  { %v3498_v33 = vunpack.i.h.bf16 %v3496_v19  ;;  %v3497_v0 = vunpack.i.l.bf16 %v3496_v19  ;;  %v3486_v34 = vpop.permute.xlu1 %3485 }
 0xe3d   :  { %v3488_v62 = vunpack.i.h.bf16 %v3486_v34  ;;  %v3487_v27 = vunpack.i.l.bf16 %v3486_v34 }
 0xe3e   :  { %v3319_v31 = vpack.c.bf16 %v3498_v33, %v3497_v0 }
 0xe3f   :  { %v1620_v36 = vsel %vm424_vm8, %v1591_v32, %v3487_v27  ;;  %v3648_v27 = vld [vmem:[%s3751_s21] sm:$0xff] }
 0xe40   :  { %v4347_v38 = vpack.i.bf16 %v3488_v62, %v1620_v36  ;;  %3321 = vmatpush3.bf16.xpose.msk.msra.mxu1 %vm3964_vm10, %v3319_v31  ;;  %v1604_v39 = vpop.permute.xlu1 %1603 }
 0xe41   :  { %v1621_v41 = vsel %vm438_vm7, %v1604_v39, %v3492_v35  ;;  %3322 = vmatprep.subr.bf16.mxu1 %v3710_v45  ;;  %v3649_v39 = vld [vmem:[%s3751_s21 + $0x8] sm:$0xff] }
 0xe42   :  { %v4355_v44 = vpack.i.bf16 %v3493_v37, %v1621_v41  ;;  %3505 = vrot.lane.b32.xlu0 %v4347_v38, %s3716_s13 }
 0xe44   :  { %3510 = vrot.lane.b32.xlu1 %v4355_v44, %s3716_s13  ;;  %v4363_v47 = vpop.permute.xlu1 %1616 }
 0xe46   :  { %1641 = vrot.lane.b32.xlu0 %v4363_v47, %s3716_s13 }
 0xe48   :  { %1542 = vrot.lane.b32.xlu1 %v1537_v50, %s3713_s0 }
 0xe4a   :  { %1544 = vrot.lane.b32.xlu0 %v1539_v52, %s3713_s0 }
 0xe4c   :  { %1546 = vrot.lane.b32.xlu1 %v1541_v54, %s3713_s0 }
 0xe4e   :  { %1555 = vrot.lane.b32.xlu0 %v1550_v55, %s3715_s9 }
 0xe50   :  { %1557 = vrot.lane.b32.xlu1 %v1552_v53, %s3715_s9 }
 0xe52   :  { %1559 = vrot.lane.b32.xlu0 %v1554_v58, %s3715_s9 }
 0xe54   :  { %1568 = vrot.lane.b32.xlu1 %v1563_v60, %s3714_s5 }
 0xe56   :  { %1570 = vrot.lane.b32.xlu0 %v1565_v1, %s3714_s5 }
 0xe58   :  { %1572 = vrot.lane.b32.xlu1 %v1567_v2, %s3714_s5 }
 0xe5a   :  { %3515 = vrot.lane.b32.xlu0 %v4325_v4, %s3717_s17 }
 0xeab   :  { %v3501_v3 = vpop.permute.xlu1 %3500 }
 0xeac   :  { %v3503_v6 = vunpack.i.h.bf16 %v3501_v3  ;;  %v3502_v7 = vunpack.i.l.bf16 %v3501_v3  ;;  %v3653_v3 = vld [vmem:[%s3751_s21 + $0x28] sm:$0xff] }
 0xeae   :  { %v3323_v10 = vpack.c.bf16 %v3503_v6, %v3502_v7 }
 0xeb0   :  { %3325 = vmatpush3.bf16.xpose.msk.msra.mxu1 %vm3964_vm10, %v3323_v10 }
 0xeb1   :  { %3326 = vmatprep.subr.bf16.mxu1 %v3710_v45 }
 0xeb4   :  { %v3506_v8 = vpop.permute.xlu0 %3505 }
 0xeb5   :  { %v3508_v12 = vunpack.i.h.bf16 %v3506_v8  ;;  %v3507_v11 = vunpack.i.l.bf16 %v3506_v8 }
 0xeb6   :  { %v3511_v13 = vpop.permute.xlu1 %3510 }
 0xeb7   :  { %v3327_v15 = vpack.c.bf16 %v3508_v12, %v3507_v11  ;;  %v3513_v4 = vunpack.i.h.bf16 %v3511_v13  ;;  %v3512_v16 = vunpack.i.l.bf16 %v3511_v13  ;;  %v3654_v12 = vld [vmem:[%s3751_s21 + $0x30] sm:$0xff] }
 0xeb8   :  { %v1642_v14 = vpop.permute.xlu0 %1641 }
 0xeb9   :  { %3329 = vmatpush3.bf16.xpose.msk.msra.mxu1 %vm3964_vm10, %v3327_v15  ;;  %v3331_v18 = vpack.c.bf16 %v3513_v4, %v3512_v16  ;;  %v3655_v4 = vld [vmem:[%s3751_s21 + $0x38] sm:$0xff] }
 0xeba   :  { %3330 = vmatprep.subr.bf16.mxu1 %v3710_v45  ;;  %v1543_v25 = vpop.permute.xlu1 %1542 }
 0xebb   :  { %v1575_v57 = vsel %vm239_vm5, %v4359_v46, %v1543_v25 }
 0xebc   :  { %v1545_v17 = vpop.permute.xlu0 %1544 }
 0xebe   :  { %v1547_v20 = vpop.permute.xlu1 %1546 }
 0xec0   :  { %v1556_v22 = vpop.permute.xlu0 %1555 }
 0xec1   :  { %3333 = vmatpush3.bf16.xpose.msk.msra.mxu1 %vm3964_vm10, %v3331_v18  ;;  %v1576_v19 = vsel %vm424_vm8, %v1547_v20, %v1556_v22 }
 0xec2   :  { %3085 = vmatprep.subr.mxu1 %v3712_v49  ;;  %v1558_v32 = vpop.permute.xlu1 %1557 }
 0xec4   :  { %v1560_v21 = vpop.permute.xlu0 %1559 }
 0xec6   :  { %v1569_v33 = vpop.permute.xlu1 %1568 }
 0xec7   :  { %v1577_v0 = vsel %vm438_vm7, %v1560_v21, %v1569_v33  ;;  %v3656_v21 = vld [vmem:[%s3751_s21 + $0x40] sm:$0xff]  ;;  %s4695_s21 = sld [smem:[#allocation10_spill]] }
 0xec8   :  { %v1571_v23 = vpop.permute.xlu0 %1570 }
 0xec9   :  { %3086 = vmatpush3.xpose.msk.msra.mxu1 %vm519_vm9, %v1642_v14 }
 0xeca   :  { %3352 = vmatprep.subr.bf16.mxu1 %v3710_v45  ;;  %v1573_v34 = vpop.permute.xlu1 %1572 }
 0xecc   :  { %3088 = vmatmul.mubr.msk.f32.vlgmr.msra.gmra.mrb[32].mxu1 %vm519_vm9, %v1531_v42  ;;  %v3516_v24 = vpop.permute.xlu0 %3515 }
 0xecd   :  { %v3518_v26 = vunpack.i.h.bf16 %v3516_v24  ;;  %v3517_v28 = vunpack.i.l.bf16 %v3516_v24  ;;  %3090 = vmatprep.mubr.msk.f32.mxu1 %vm3711_vm6, %v3712_v49 }
 0xecf   :  { %v3335_v29 = vpack.c.bf16 %v3518_v26, %v3517_v28 }
 0xed0   :  { %3091 = vmatmul.mubr.msk.f32.gmra.mrb[34].mxu1 %vm519_vm9, %v4351_v40 }
 0xed1   :  { %3336 = vmatpush3.bf16.msra.mxu0 %v3335_v29  ;;  %3093 = vmatprep.mubr.msk.f32.mxu1 %vm3711_vm6, %v3712_v49 }
 0xed2   :  { %3337 = vmatprep.subr.bf16.mxu0 %v3710_v45 }
 0xed4   :  { %3094 = vmatmul.mubr.msk.f32.gmra.mrb[36].mxu1 %vm519_vm9, %v1575_v57 }
 0xed5   :  { %3096 = vmatprep.mubr.msk.f32.mxu1 %vm3711_vm6, %v3712_v49 }
 0xed8   :  { %3097 = vmatmul.mubr.msk.f32.gmra.mrb[38].mxu1 %vm519_vm9, %v1545_v17 }
 0xed9   :  { %3099 = vmatprep.mubr.msk.f32.mxu1 %vm3711_vm6, %v3712_v49 }
 0xedc   :  { %3100 = vmatmul.mubr.msk.f32.gmra.mrb[40].mxu1 %vm519_vm9, %v1576_v19 }
 0xedd   :  { %3102 = vmatprep.mubr.msk.f32.mxu1 %vm3711_vm6, %v3712_v49 }
 0xee0   :  { %3103 = vmatmul.mubr.msk.f32.gmra.mrb[42].mxu1 %vm519_vm9, %v1558_v32 }
 0xee1   :  { %3105 = vmatprep.mubr.msk.f32.mxu1 %vm3711_vm6, %v3712_v49 }
 0xee4   :  { %3106 = vmatmul.mubr.msk.f32.gmra.mrb[44].mxu1 %vm519_vm9, %v1577_v0 }
 0xee5   :  { %3108 = vmatprep.mubr.msk.f32.mxu1 %vm3711_vm6, %v3712_v49 }
 0xee8   :  { %3109 = vmatmul.mubr.msk.f32.gmra.mrb[46].mxu1 %vm519_vm9, %v1571_v23 }
 0xee9   :  { %3111 = vmatprep.mubr.msk.f32.mxu1 %vm3711_vm6, %v3712_v49 }
 0xeec   :  { %3112 = vmatmul.mubr.msk.f32.gmra.mrb[48].mxu1 %vm519_vm9, %v1573_v34 }
 0xeed   :  { %3184 = vmatprep.mubr.msk.f32.mxu1 %vm3711_vm6, %v3712_v49 }
 0xf9f   :  { %v1748_v62 = vpop.f32.mrb[32].mxu1 }
 0xfa0   :  { %v1749_v31 = vadd.f32 %v3648_v27, %v1748_v62  ;;  %v3089_v35 = vpop.f32.mrb[33].mxu1 }
 0xfa2   :  { %v1792_v36 = vsel %vm669_vm11, %v1749_v31, -inf }
 0xfa3   :  { %1793 = vmax.xlane.f32.xlu0 %v1792_v36  ;;  %v1753_v37 = vpop.f32.mrb[34].mxu1 }
 0xfa4   :  { %v1754_v40 = vadd.f32 %v3649_v39, %v1753_v37  ;;  %v3092_v41 = vpop.f32.mrb[35].mxu1 }
 0xfa6   :  { %v1795_v42 = vsel %vm669_vm11, %v1754_v40, -inf }
 0xfa7   :  { %1796 = vmax.xlane.f32.xlu1 %v1795_v42  ;;  %v1758_v46 = vpop.f32.mrb[36].mxu1 }
 0xfa8   :  { %v1759_v50 = vadd.f32 %v3650_v48, %v1758_v46  ;;  %v3095_v51 = vpop.f32.mrb[37].mxu1 }
 0xfaa   :  { %v1798_v52 = vsel %vm669_vm11, %v1759_v50, -inf }
 0xfab   :  { %1799 = vmax.xlane.f32.xlu0 %v1798_v52  ;;  %v1763_v54 = vpop.f32.mrb[38].mxu1 }
 0xfac   :  { %v1764_v55 = vadd.f32 %v3651_v43, %v1763_v54  ;;  %v3098_v56 = vpop.f32.mrb[39].mxu1 }
 0xfae   :  { %v1801_v53 = vsel %vm669_vm11, %v1764_v55, -inf }
 0xfaf   :  { %1802 = vmax.xlane.f32.xlu0 %v1801_v53  ;;  %v1768_v58 = vpop.f32.mrb[40].mxu1 }
 0xfb0   :  { %v1769_v60 = vadd.f32 %v3652_v59, %v1768_v58  ;;  %v3101_v61 = vpop.f32.mrb[41].mxu1 }
 0xfb2   :  { %v1804_v1 = vsel %vm669_vm11, %v1769_v60, -inf }
 0xfb3   :  { %1805 = vmax.xlane.f32.xlu0 %v1804_v1  ;;  %v1773_v2 = vpop.f32.mrb[42].mxu1 }
 0xfb4   :  { %v1774_v6 = vadd.f32 %v3653_v3, %v1773_v2  ;;  %v3104_v7 = vpop.f32.mrb[43].mxu1 }
 0xfb6   :  { %v1807_v10 = vsel %vm669_vm11, %v1774_v6, -inf }
 0xfb7   :  { %1808 = vmax.xlane.f32.xlu1 %v1807_v10  ;;  %v1778_v8 = vpop.f32.mrb[44].mxu1 }
 0xfb8   :  { %v4447_v11 = vadd.f32 %v3654_v12, %v1778_v8  ;;  %v3107_v15 = vpop.f32.mrb[45].mxu1 }
 0xfba   :  { %v1810_v13 = vsel %vm669_vm11, %v4447_v11, -inf }
 0xfbb   :  { %1811 = vmax.xlane.f32.xlu0 %v1810_v13  ;;  %v1783_v14 = vpop.f32.mrb[46].mxu1 }
 0xfbc   :  { %v4452_v16 = vadd.f32 %v3655_v4, %v1783_v14  ;;  %v3110_v17 = vpop.f32.mrb[47].mxu1 }
 0xfbe   :  { %v1813_v18 = vsel %vm669_vm11, %v4452_v16, -inf }
 0xfbf   :  { %1814 = vmax.xlane.f32.xlu1 %v1813_v18  ;;  %v1788_v22 = vpop.f32.mrb[48].mxu1 }
 0xfc0   :  { %v4457_v23 = vadd.f32 %v3656_v21, %v1788_v22  ;;  %v3113_v24 = vpop.f32.mrb[49].mxu1 }
 0xfc2   :  { %v1816_v26 = vsel %vm669_vm11, %v4457_v23, -inf }
 0xfc3   :  { %1817 = vmax.xlane.f32.xlu0 %v1816_v26 }
 0xfd0   :  { %3520 = vrot.lane.b32.xlu1 %v4342_v30, %s3717_s17 }
 0xfd9   :  { %3525 = vrot.lane.b32.xlu0 %v4347_v38, %s3717_s17 }
0x1030   :  { %v1794_v28 = vpop.xlane.xlu0 %1793 }
0x1031   :  { %v1819_v25 = vsub.f32 %v1749_v31, %v1794_v28 }
0x1033   :  { %v1828_v29 = vmul.f32 1.442695, %v1819_v25 }
0x1034   :  { %v1797_v57 = vpop.xlane.xlu1 %1796 }
0x1035   :  { %3594 = vpow2.f32 %v1828_v29  ;;  %v1820_v20 = vsub.f32 %v1754_v40, %v1797_v57 }
0x1037   :  { %v1830_v32 = vmul.f32 1.442695, %v1820_v20 }
0x1038   :  { %v1800_v19 = vpop.xlane.xlu0 %1799 }
0x1039   :  { %3596 = vpow2.f32 %v1830_v32  ;;  %v1821_v33 = vsub.f32 %v1759_v50, %v1800_v19 }
0x103b   :  { %v1832_v0 = vmul.f32 1.442695, %v1821_v33 }
0x103c   :  { %v1803_v34 = vpop.xlane.xlu0 %1802 }
0x103d   :  { %3598 = vpow2.f32 %v1832_v0  ;;  %v1822_v62 = vsub.f32 %v1764_v55, %v1803_v34 }
0x103f   :  { %v4465_v27 = vpop.eup %3594  ;;  %v1834_v30 = vmul.f32 1.442695, %v1822_v62 }
0x1040   :  { %v1806_v35 = vpop.xlane.xlu0 %1805  ;;  %v1846_v38 = vsel %vm669_vm11, %v4465_v27, 0.0 }
0x1041   :  { %3600 = vpow2.f32 %v1834_v30  ;;  %v1823_v31 = vsub.f32 %v1769_v60, %v1806_v35  ;;  %1847 = vadd.xlane.f32.xlu1 %v1846_v38 }
0x1043   :  { %v4469_v36 = vpop.eup %3596  ;;  %v1836_v37 = vmul.f32 1.442695, %v1823_v31 }
0x1044   :  { %v1809_v39 = vpop.xlane.xlu1 %1808  ;;  %v1849_v40 = vsel %vm669_vm11, %v4469_v36, 0.0 }
0x1045   :  { %3602 = vpow2.f32 %v1836_v37  ;;  %v1824_v41 = vsub.f32 %v1774_v6, %v1809_v39  ;;  %1850 = vadd.xlane.f32.xlu0 %v1849_v40 }
0x1047   :  { %v4473_v42 = vpop.eup %3598  ;;  %v1838_v46 = vmul.f32 1.442695, %v1824_v41 }
0x1048   :  { %v1852_v48 = vsel %vm669_vm11, %v4473_v42, 0.0  ;;  %v1812_v51 = vpop.xlane.xlu0 %1811 }
0x1049   :  { %3604 = vpow2.f32 %v1838_v46  ;;  %1853 = vadd.xlane.f32.xlu1 %v1852_v48  ;;  %v1825_v10 = vsub.f32 %v4447_v11, %v1812_v51 }
0x104b   :  { %v4477_v50 = vpop.eup %3600  ;;  %v1840_v12 = vmul.f32 1.442695, %v1825_v10 }
0x104c   :  { %v1815_v52 = vpop.xlane.xlu1 %1814  ;;  %v1855_v54 = vsel %vm669_vm11, %v4477_v50, 0.0 }
0x104d   :  { %1856 = vadd.xlane.f32.xlu1 %v1855_v54  ;;  %v1826_v8 = vsub.f32 %v4452_v16, %v1815_v52  ;;  %3606 = vpow2.f32 %v1840_v12 }
0x104f   :  { %v4481_v43 = vpop.eup %3602  ;;  %v1842_v13 = vmul.f32 1.442695, %v1826_v8 }
0x1050   :  { %v3521_v55 = vpop.permute.xlu1 %3520  ;;  %v1818_v56 = vpop.xlane.xlu0 %1817  ;;  %v1858_v53 = vsel %vm669_vm11, %v4481_v43, 0.0 }
0x1051   :  { %v3523_v58 = vunpack.i.h.bf16 %v3521_v55  ;;  %v3522_v59 = vunpack.i.l.bf16 %v3521_v55  ;;  %1859 = vadd.xlane.f32.xlu1 %v1858_v53  ;;  %v1827_v15 = vsub.f32 %v4457_v23, %v1818_v56  ;;  %3608 = vpow2.f32 %v1842_v13  ;;  %v2113_v56 = vld [vmem:[%s4695_s21] sm:$0xff]  ;;  %v2114_v53 = vld [vmem:[%s4695_s21 + $0x8] sm:$0xff] }
0x1053   :  { %v4485_v60 = vpop.eup %3604  ;;  %v3338_v61 = vpack.c.bf16 %v3523_v58, %v3522_v59  ;;  %v1844_v14 = vmul.f32 1.442695, %v1827_v15  ;;  %v3347_v59 = vpack.c.bf16 %v2114_v53, %v2113_v56 }
0x1054   :  { %v3526_v1 = vpop.permute.xlu0 %3525  ;;  %v1861_v2 = vsel %vm669_vm11, %v4485_v60, 0.0 }
0x1055   :  { %v3528_v3 = vunpack.i.h.bf16 %v3526_v1  ;;  %v3527_v6 = vunpack.i.l.bf16 %v3526_v1  ;;  %3339 = vmatpush3.bf16.msra.mxu0 %v3338_v61  ;;  %1862 = vadd.xlane.f32.xlu0 %v1861_v2  ;;  %3610 = vpow2.f32 %v1844_v14  ;;  %v2115_v61 = vld [vmem:[%s4695_s21 + $0x10] sm:$0xff]  ;;  %v2116_v1 = vld [vmem:[%s4695_s21 + $0x18] sm:$0xff] }
0x1056   :  { %3340 = vmatprep.subr.bf16.mxu0 %v3710_v45 }
0x1057   :  { %v3341_v7 = vpack.c.bf16 %v3528_v3, %v3527_v6  ;;  %v3607_v4 = vpop.eup %3606  ;;  %v3350_v3 = vpack.c.bf16 %v2116_v1, %v2115_v61 }
0x1059   :  { %3342 = vmatpush3.bf16.msra.mxu0 %v3341_v7 }
0x105a   :  { %3343 = vmatprep.subr.bf16.mxu0 %v3710_v45 }
0x105b   :  { %v4498_v17 = vpop.eup %3608 }
0x105f   :  { %v4501_v18 = vpop.eup %3610 }
0x1060   :  { %v1870_v11 = vsel %vm669_vm11, %v4501_v18, 0.0 }
0x1062   :  { %1907 = vrot.lane.b32.xlu1 %v4363_v47, %s3717_s17  ;;  %v1864_v47 = vsel %vm669_vm11, %v3607_v4, 0.0 }
0x106b   :  { %3530 = vrot.lane.b32.xlu0 %v4355_v44, %s3717_s17  ;;  %v1867_v44 = vsel %vm669_vm11, %v4498_v17, 0.0 }
0x1086   :  { %1865 = vadd.xlane.f32.xlu1 %v1864_v47 }
0x108a   :  { %1868 = vadd.xlane.f32.xlu1 %v1867_v44  ;;  %1871 = vadd.xlane.f32.xlu0 %v1870_v11 }
0x10ce   :  { %v1848_v16 = vpop.xlane.xlu1 %1847 }
0x10cf   :  { %3612 = vrcp.f32 %v1848_v16 }
0x10d2   :  { %v1851_v21 = vpop.xlane.xlu0 %1850 }
0x10d3   :  { %3614 = vrcp.f32 %v1851_v21 }
0x10d6   :  { %v1854_v22 = vpop.xlane.xlu1 %1853 }
0x10d7   :  { %3616 = vrcp.f32 %v1854_v22 }
0x10d9   :  { %v3613_v20 = vpop.eup %3612 }
0x10da   :  { %v1857_v23 = vpop.xlane.xlu1 %1856  ;;  %v1882_v32 = vmul.f32 %v3613_v20, %v4465_v27 }
0x10db   :  { %3618 = vrcp.f32 %v1857_v23 }
0x10dd   :  { %v3615_v33 = vpop.eup %3614 }
0x10de   :  { %v1860_v29 = vpop.xlane.xlu1 %1859  ;;  %v1883_v0 = vmul.f32 %v3615_v33, %v4469_v36 }
0x10df   :  { %3620 = vrcp.f32 %v1860_v29 }
0x10e1   :  { %v3617_v34 = vpop.eup %3616 }
0x10e2   :  { %v1863_v24 = vpop.xlane.xlu0 %1862  ;;  %v1908_v19 = vpop.permute.xlu1 %1907  ;;  %v1884_v62 = vmul.f32 %v3617_v34, %v4473_v42 }
0x10e3   :  { %3622 = vrcp.f32 %v1863_v24 }
0x10e5   :  { %v3619_v27 = vpop.eup %3618 }
0x10e6   :  { %v3531_v26 = vpop.permute.xlu0 %3530  ;;  %v1885_v30 = vmul.f32 %v3619_v27, %v4477_v50 }
0x10e7   :  { %v3533_v28 = vunpack.i.h.bf16 %v3531_v26  ;;  %v3532_v25 = vunpack.i.l.bf16 %v3531_v26 }
0x10e9   :  { %v3344_v57 = vpack.c.bf16 %v3533_v28, %v3532_v25  ;;  %v3621_v35 = vpop.eup %3620 }
0x10ea   :  { %v1886_v38 = vmul.f32 %v3621_v35, %v4481_v43 }
0x10eb   :  { %3345 = vmatpush3.bf16.msra.mxu0 %v3344_v57 }
0x10ec   :  { %3130 = vmatprep.subr.mxu0 %v3712_v49 }
0x10ed   :  { %v3623_v31 = vpop.eup %3622 }
0x10ee   :  { %v1887_v36 = vmul.f32 %v3623_v31, %v4485_v60 }
0x10ef   :  { %3131 = vmatpush3.msra.mxu0 %v1908_v19 }
0x10f0   :  { %3133 = vmatmul.mubr.msk.f32.vlgmr.msra.gmra.mrb[36].mxu0 %vm669_vm11, %v1882_v32  ;;  %3346 = vmatprep.subr.bf16.mxu0 %v3710_v45 }
0x10f1   :  { %3135 = vmatprep.mubr.msk.f32.mxu0 %vm3711_vm6, %v3712_v49  ;;  %3348 = vmatpush3.bf16.msra.mxu0 %v3347_v59 }
0x10f2   :  { %3349 = vmatprep.subr.bf16.mxu0 %v3710_v45 }
0x10f4   :  { %3136 = vmatmul.mubr.msk.f32.gmra.mrb[38].mxu0 %vm669_vm11, %v1883_v0 }
0x10f5   :  { %3138 = vmatprep.mubr.msk.f32.mxu0 %vm3711_vm6, %v3712_v49  ;;  %3351 = vmatpush3.bf16.msra.mxu0 %v3350_v3 }
0x10f6   :  { %3358 = vmatprep.subr.bf16.mxu0 %v3710_v45 }
0x10f8   :  { %3139 = vmatmul.mubr.msk.f32.gmra.mrb[40].mxu0 %vm669_vm11, %v1884_v62 }
0x10f9   :  { %3141 = vmatprep.mubr.msk.f32.mxu0 %vm3711_vm6, %v3712_v49 }
0x10fc   :  { %3142 = vmatmul.mubr.msk.f32.gmra.mrb[42].mxu0 %vm669_vm11, %v1885_v30 }
0x10fd   :  { %3144 = vmatprep.mubr.msk.f32.mxu0 %vm3711_vm6, %v3712_v49 }
0x1100   :  { %3145 = vmatmul.mubr.msk.f32.gmra.mrb[44].mxu0 %vm669_vm11, %v1886_v38 }
0x1101   :  { %3147 = vmatprep.mubr.msk.f32.mxu0 %vm3711_vm6, %v3712_v49 }
0x1104   :  { %3148 = vmatmul.mubr.msk.f32.gmra.mrb[46].mxu0 %vm669_vm11, %v1887_v36 }
0x1105   :  { %3150 = vmatprep.mubr.msk.f32.mxu0 %vm3711_vm6, %v3712_v49 }
0x1113   :  { %v1866_v37 = vpop.xlane.xlu1 %1865 }
0x1114   :  { %3624 = vrcp.f32 %v1866_v37 }
0x1117   :  { %v1869_v39 = vpop.xlane.xlu1 %1868  ;;  %v1872_v40 = vpop.xlane.xlu0 %1871 }
0x1118   :  { %3626 = vrcp.f32 %v1869_v39 }
0x1119   :  { %3628 = vrcp.f32 %v1872_v40 }
0x111e   :  { %v3625_v41 = vpop.eup %3624 }
0x111f   :  { %v1888_v42 = vmul.f32 %v3625_v41, %v3607_v4 }
0x1121   :  { %3151 = vmatmul.mubr.msk.f32.gmra.mrb[48].mxu0 %vm669_vm11, %v1888_v42 }
0x1122   :  { %v3627_v46 = vpop.eup %3626  ;;  %3153 = vmatprep.mubr.msk.f32.mxu0 %vm3711_vm6, %v3712_v49 }
0x1123   :  { %v1889_v48 = vmul.f32 %v3627_v46, %v4498_v17  ;;  %v3629_v50 = vpop.eup %3628 }
0x1124   :  { %v1890_v51 = vmul.f32 %v3629_v50, %v4501_v18  ;;  %v2685_v50 = vld [vmem:[%s4696_s12] ss:$0 sm:$0xff] }
0x1125   :  { %3154 = vmatmul.mubr.msk.f32.gmra.mrb[50].mxu0 %vm669_vm11, %v1889_v48 }
0x1126   :  { %3156 = vmatprep.mubr.msk.f32.mxu0 %vm3711_vm6, %v3712_v49 }
0x1129   :  { %3157 = vmatmul.mubr.msk.f32.gmra.mrb[52].mxu0 %vm669_vm11, %v1890_v51 }
0x112a   :  { %3167 = vmatprep.mubr.msk.f32.mxu0 %vm3711_vm6, %v3712_v49 }
0x11c3   :  { %v2011_v52 = vpop.f32.mrb[36].mxu0 }
0x11c4   :  { %v3134_v54 = vpop.f32.mrb[37].mxu0 }
0x11c7   :  { %v2016_v43 = vpop.f32.mrb[38].mxu0 }
0x11c8   :  { %v3137_v55 = vpop.f32.mrb[39].mxu0 }
0x11cb   :  { %v4546_v58 = vpop.f32.mrb[40].mxu0 }
0x11cc   :  { %v3140_v60 = vpop.f32.mrb[41].mxu0  ;;  %v2058_v6 = vrot.slane %v4546_v58, 2 }
0x11cf   :  { %v2026_v2 = vpop.f32.mrb[42].mxu0 }
0x11d0   :  { %v2059_v7 = vrot.slane %v2026_v2, 2  ;;  %v3143_v10 = vpop.f32.mrb[43].mxu0 }
0x11d2   :  { %v2060_v8 = vsel %vm438_vm7, %v2058_v6, %v2059_v7  ;;  %v2275_v6 = vld [vmem:[%s4697_s7] sm:$0xff] }
0x11d3   :  { %2063 = vrot.lane.b32.xlu0 %v2060_v8, %s3718_s25  ;;  %v2031_v12 = vpop.f32.mrb[44].mxu0 }
0x11d4   :  { %v2061_v15 = vrot.slane %v2031_v12, 2  ;;  %v3146_v13 = vpop.f32.mrb[45].mxu0  ;;  %v2074_v17 = vrot.slane %v2031_v12, 4 }
0x11d6   :  { %v2062_v14 = vsel %vm438_vm7, %v2059_v7, %v2061_v15  ;;  %v2276_v7 = vld [vmem:[%s4697_s7 + $0x8] sm:$0xff] }
0x11d7   :  { %2065 = vrot.lane.b32.xlu0 %v2062_v14, %s3718_s25  ;;  %v2036_v4 = vpop.f32.mrb[46].mxu0  ;;  %v3353_v10 = vpack.c.bf16 %v2276_v7, %v2275_v6  ;;  %v2400_v6 = vld [vmem:[%s4698_s10 + $0x50] sm:$0xff]  ;;  %v2401_v7 = vld [vmem:[%s4698_s10 + $0x58] sm:$0xff] }
0x11d8   :  { %v2075_v47 = vrot.slane %v2036_v4, 4  ;;  %v3149_v18 = vpop.f32.mrb[47].mxu0 }
0x11d9   :  { %3354 = vmatpush3.bf16.msra.mxu1 %v3353_v10  ;;  %v3374_v10 = vpack.c.bf16 %v2401_v7, %v2400_v6 }
0x11da   :  { %v2076_v44 = vsel %vm424_vm8, %v2074_v17, %v2075_v47  ;;  %3355 = vmatprep.subr.bf16.mxu1 %v3710_v45 }
0x11db   :  { %2079 = vrot.lane.b32.xlu1 %v2076_v44, %s3719_s29 }
0x11f4   :  { %v2041_v11 = vpop.f32.mrb[48].mxu0 }
0x11f5   :  { %v2077_v16 = vrot.slane %v2041_v11, 4  ;;  %v3152_v22 = vpop.f32.mrb[49].mxu0  ;;  %v2090_v24 = vrot.slane %v2041_v11, 6 }
0x11f7   :  { %v2078_v21 = vsel %vm424_vm8, %v2075_v47, %v2077_v16 }
0x11f8   :  { %2081 = vrot.lane.b32.xlu1 %v2078_v21, %s3719_s29  ;;  %v2046_v23 = vpop.f32.mrb[50].mxu0  ;;  %v2277_v21 = vld [vmem:[%s4697_s7 + $0x10] sm:$0xff] }
0x11f9   :  { %v2091_v26 = vrot.slane %v2046_v23, 6  ;;  %v3155_v28 = vpop.f32.mrb[51].mxu0  ;;  %v2278_v23 = vld [vmem:[%s4697_s7 + $0x18] sm:$0xff] }
0x11fa   :  { %v2391_v28 = vld [vmem:[%s4698_s10 + $0x8] sm:$0xff] }
0x11fb   :  { %v2092_v25 = vsel %vm239_vm5, %v2090_v24, %v2091_v26  ;;  %v3356_v24 = vpack.c.bf16 %v2278_v23, %v2277_v21 }
0x11fc   :  { %2095 = vrot.lane.b32.xlu1 %v2092_v25, %s3720_s3  ;;  %v2051_v29 = vpop.f32.mrb[52].mxu0  ;;  %v2392_v25 = vld [vmem:[%s4698_s10 + $0x10] sm:$0xff] }
0x11fd   :  { %v2093_v57 = vrot.slane %v2051_v29, 6  ;;  %v3158_v20 = vpop.f32.mrb[53].mxu0  ;;  %3357 = vmatpush3.bf16.msra.mxu1 %v3356_v24 }
0x11ff   :  { %v2094_v32 = vsel %vm239_vm5, %v2091_v26, %v2093_v57  ;;  %v2390_v26 = vld [vmem:[%s4698_s10] sm:$0xff] }
0x1200   :  { %2067 = vrot.lane.b32.xlu1 %v2061_v15, %s3718_s25  ;;  %2097 = vrot.lane.b32.xlu0 %v2094_v32, %s3720_s3  ;;  %v3359_v29 = vpack.c.bf16 %v2391_v28, %v2390_v26  ;;  %v2394_v32 = vld [vmem:[%s4698_s10 + $0x20] sm:$0xff] }
0x1204   :  { %2099 = vrot.lane.b32.xlu1 %v2093_v57, %s3720_s3  ;;  %2083 = vrot.lane.b32.xlu0 %v2077_v16, %s3719_s29  ;;  %v2393_v57 = vld [vmem:[%s4698_s10 + $0x18] sm:$0xff] }
0x1205   :  { %v3362_v20 = vpack.c.bf16 %v2393_v57, %v2392_v25 }
0x1245   :  { %v2064_v33 = vpop.permute.xlu0 %2063 }
0x1246   :  { %v2104_v34 = vsel %vm519_vm9, %v2011_v52, %v2064_v33 }
0x1249   :  { %v2066_v62 = vpop.permute.xlu0 %2065 }
0x124a   :  { %v2105_v38 = vsel %vm519_vm9, %v2016_v43, %v2066_v62 }
0x124d   :  { %v2080_v19 = vpop.permute.xlu1 %2079 }
0x124e   :  { %v2107_v27 = vsel %vm985_vm12, %v2104_v34, %v2080_v19  ;;  %v2395_v19 = vld [vmem:[%s4698_s10 + $0x28] sm:$0xff] }
0x124f   :  { %v3365_v33 = vpack.c.bf16 %v2395_v19, %v2394_v32 }
0x126a   :  { %v2082_v0 = vpop.permute.xlu1 %2081 }
0x126b   :  { %v2108_v31 = vsel %vm985_vm12, %v2105_v38, %v2082_v0 }
0x126e   :  { %v2096_v30 = vpop.permute.xlu1 %2095 }
0x126f   :  { %v2110_v35 = vsel %vm989_vm13, %v2107_v27, %v2096_v30 }
0x1270   :  { %3168 = vmatmul.mubr.msk.f32.vlgmr.msra.gmra.mrb[54].mxu0 %vm252_vm4, %v2110_v35 }
0x1271   :  { %3170 = vmatprep.mubr.msk.f32.mxu0 %vm3711_vm6, %v3712_v49  ;;  %3360 = vmatpush3.bf16.msra.mxu0 %v3359_v29 }
0x1272   :  { %v2068_v36 = vpop.permute.xlu1 %2067  ;;  %v2098_v37 = vpop.permute.xlu0 %2097  ;;  %3361 = vmatprep.subr.bf16.mxu0 %v3710_v45 }
0x1273   :  { %v2111_v39 = vsel %vm989_vm13, %v2108_v31, %v2098_v37  ;;  %v2106_v40 = vsel %vm519_vm9, %v4546_v58, %v2068_v36 }
0x1274   :  { %3171 = vmatmul.mubr.msk.f32.gmra.mrb[56].mxu0 %vm252_vm4, %v2111_v39  ;;  %v2689_v39 = vld [vmem:[%s4699_s11] ss:$0 sm:$0xff] }
0x1275   :  { %3173 = vmatprep.mubr.msk.f32.mxu0 %vm3711_vm6, %v3712_v49  ;;  %3363 = vmatpush3.bf16.msra.mxu0 %v3362_v20 }
0x1276   :  { %v2100_v41 = vpop.permute.xlu1 %2099  ;;  %v2084_v42 = vpop.permute.xlu0 %2083  ;;  %3364 = vmatprep.subr.bf16.mxu0 %v3710_v45 }
0x1277   :  { %v2109_v46 = vsel %vm985_vm12, %v2106_v40, %v2084_v42 }
0x1278   :  { %v2112_v48 = vsel %vm989_vm13, %v2109_v46, %v2100_v41  ;;  %v2690_v41 = vld [vmem:[%s4700_s15] ss:$0 sm:$0xff] }
0x1279   :  { %3174 = vmatmul.mubr.msk.f32.gmra.mrb[58].mxu0 %vm252_vm4, %v2112_v48 }
0x127a   :  { %3225 = vmatprep.mubr.msk.f32.mxu0 %vm3711_vm6, %v3712_v49  ;;  %3366 = vmatpush3.bf16.msra.mxu0 %v3365_v33 }
0x127b   :  { %3367 = vmatprep.subr.bf16.mxu0 %v3710_v45 }
0x1343   :  { %v2199_v51 = vpop.f32.mrb[54].mxu0 }
0x1344   :  { %v2200_v52 = vadd.f32 %v2685_v50, %v2199_v51  ;;  %v3169_v54 = vpop.f32.mrb[55].mxu0 }
0x1346   :  { %v4589_v43 = vadd.f32 %v2200_v52, %v4288_v63 }
0x1347   :  { %v2204_v55 = vpop.f32.mrb[56].mxu0 }
0x1348   :  { %v2205_v56 = vadd.f32 %v2685_v50, %v2204_v55  ;;  %v3172_v53 = vpop.f32.mrb[57].mxu0  ;;  %v2218_v58 = vsel %vm252_vm4, %v4589_v43, 0.0 }
0x1349   :  { %2219 = vadd.xlane.f32.xlu0 %v2218_v58  ;;  %v2396_v58 = vld [vmem:[%s4698_s10 + $0x30] sm:$0xff] }
0x134a   :  { %v4594_v59 = vadd.f32 %v2205_v56, %v4293_v5 }
0x134c   :  { %v2209_v60 = vpop.f32.mrb[58].mxu0  ;;  %v2221_v61 = vsel %vm252_vm4, %v4594_v59, 0.0 }
0x134d   :  { %v2210_v1 = vadd.f32 %v2685_v50, %v2209_v60  ;;  %2222 = vadd.xlane.f32.xlu1 %v2221_v61  ;;  %v3175_v2 = vpop.f32.mrb[59].mxu0  ;;  %v2397_v60 = vld [vmem:[%s4698_s10 + $0x38] sm:$0xff] }
0x134e   :  { %v3368_v61 = vpack.c.bf16 %v2397_v60, %v2396_v58  ;;  %v2399_v2 = vld [vmem:[%s4698_s10 + $0x48] sm:$0xff] }
0x134f   :  { %v4599_v63 = vadd.f32 %v2210_v1, %v4298_v9  ;;  %v2398_v1 = vld [vmem:[%s4698_s10 + $0x40] sm:$0xff] }
0x1350   :  { %3369 = vmatpush3.bf16.msra.mxu0 %v3368_v61 }
0x1351   :  { %v2224_v3 = vsel %vm259_vm2, %v4599_v63, 0.0  ;;  %3370 = vmatprep.subr.bf16.mxu0 %v3710_v45 }
0x1352   :  { %2225 = vadd.xlane.f32.xlu0 %v2224_v3  ;;  %v3371_v3 = vpack.c.bf16 %v2399_v2, %v2398_v1 }
0x1354   :  { %3372 = vmatpush3.bf16.msra.mxu0 %v3371_v3 }
0x1355   :  { %3373 = vmatprep.subr.bf16.mxu0 %v3710_v45 }
0x1358   :  { %3375 = vmatpush3.bf16.msra.mxu0 %v3374_v10 }
0x1359   :  { %3376 = vmatprep.subr.bf16.mxu0 %v3710_v45 }
0x13d6   :  { %v2220_v5 = vpop.xlane.xlu0 %2219 }
0x13d7   :  { %v2227_v8 = vmul.f32 0.03125, %v2220_v5  ;;  %v2402_v5 = vld [vmem:[%s4698_s10 + $0x60] sm:$0xff] }
0x13d9   :  { %v2230_v12 = vsub.f32 %v4589_v43, %v2227_v8  ;;  %v2403_v8 = vld [vmem:[%s4698_s10 + $0x68] sm:$0xff] }
0x13da   :  { %v2223_v15 = vpop.xlane.xlu1 %2222 }
0x13db   :  { %v2228_v13 = vmul.f32 0.03125, %v2223_v15  ;;  %v2233_v9 = vmul.f32 %v2230_v12, %v2230_v12  ;;  %v2404_v15 = vld [vmem:[%s4698_s10 + $0x70] sm:$0xff] }
0x13dd   :  { %v2231_v14 = vsub.f32 %v4594_v59, %v2228_v13  ;;  %v2236_v4 = vsel %vm252_vm4, %v2233_v9, 0.0  ;;  %v2405_v13 = vld [vmem:[%s4698_s10 + $0x78] sm:$0xff] }
0x13de   :  { %2237 = vadd.xlane.f32.xlu0 %v2236_v4  ;;  %v3380_v9 = vpack.c.bf16 %v2405_v13, %v2404_v15 }
0x13df   :  { %v2226_v17 = vpop.xlane.xlu0 %2225  ;;  %v2234_v47 = vmul.f32 %v2231_v14, %v2231_v14 }
0x13e0   :  { %v2229_v18 = vmul.f32 0.03125, %v2226_v17 }
0x13e1   :  { %v2239_v44 = vsel %vm252_vm4, %v2234_v47, 0.0 }
0x13e2   :  { %v2232_v11 = vsub.f32 %v4599_v63, %v2229_v18  ;;  %2240 = vadd.xlane.f32.xlu0 %v2239_v44 }
0x13e4   :  { %v2235_v16 = vmul.f32 %v2232_v11, %v2232_v11 }
0x13e6   :  { %v2242_v22 = vsel %vm259_vm2, %v2235_v16, 0.0 }
0x13e7   :  { %2243 = vadd.xlane.f32.xlu1 %v2242_v22 }
0x146b   :  { %v2238_v0 = vpop.xlane.xlu0 %2237 }
0x146c   :  { %v2245_v34 = vmul.f32 0.03125, %v2238_v0 }
0x146e   :  { %v2248_v62 = vadd.f32 1e-05, %v2245_v34 }
0x146f   :  { %v2241_v27 = vpop.xlane.xlu0 %2240 }
0x1470   :  { %3630 = vrsqrt.f32 %v2248_v62  ;;  %v2246_v30 = vmul.f32 0.03125, %v2241_v27 }
0x1472   :  { %v2249_v35 = vadd.f32 1e-05, %v2246_v30  ;;  %v2695_v30 = vld [vmem:[%s3861_s6] ss:$0 sm:$0xff]  ;;  %s3721_s6 = smov [#allocation2]  }
0x1473   :  { %s2566_s18 = sshll.u32 %s3721_s6, 4  ;;  %s2567_s18 = int_to_ptr.vmem [resolvable:$true] %s2566_s18 }
0x1474   :  { %3632 = vrsqrt.f32 %v2249_v35  ;;  %v2244_v38 = vpop.xlane.xlu1 %2243  ;;  %p3662_p1 = scmp.lt.s32.totalorder %s2567_s18, %s2567_s18 }
0x1475   :  { %v2247_v31 = vmul.f32 0.03125, %v2244_v38 }
0x1477   :  { %v2250_v36 = vadd.f32 1e-05, %v2247_v31 }
0x1479   :  { %3634 = vrsqrt.f32 %v2250_v36 }
0x147a   :  { %v3631_v37 = vpop.eup %3630 }
0x147b   :  { %v2254_v40 = vmul.f32 %v3631_v37, %v2230_v12  ;;  %v3377_v12 = vpack.c.bf16 %v2403_v8, %v2402_v5 }
0x147d   :  { %v2263_v42 = vmul.f32 %v2689_v39, %v2254_v40  ;;  %3378 = vmatpush3.bf16.msra.mxu0 %v3377_v12 }
0x147e   :  { %v3633_v46 = vpop.eup %3632  ;;  %3379 = vmatprep.subr.bf16.mxu0 %v3710_v45 }
0x147f   :  { %v2272_v48 = vadd.f32 %v2690_v41, %v2263_v42  ;;  %v2255_v50 = vmul.f32 %v3633_v46, %v2231_v14  ;;  %v2691_v14 = vld [vmem:[%s4701_s16] ss:$0 sm:$0xff] }
0x1481   :  { %3185 = vmatmul.mubr.msk.f32.vlgmr.msra.gmra.mrb[50].mxu1 %vm252_vm4, %v2272_v48  ;;  %v2264_v51 = vmul.f32 %v2689_v39, %v2255_v50  ;;  %3381 = vmatpush3.bf16.msra.mxu0 %v3380_v9 }
0x1482   :  { %3187 = vmatprep.mubr.msk.f32.mxu1 %vm3711_vm6, %v3712_v49 }
0x1483   :  { %v3635_v52 = vpop.eup %3634  ;;  %v2273_v54 = vadd.f32 %v2690_v41, %v2264_v51 }
0x1484   :  { %v2256_v55 = vmul.f32 %v3635_v52, %v2232_v11 }
0x1485   :  { %3188 = vmatmul.mubr.msk.f32.gmra.mrb[52].mxu1 %vm252_vm4, %v2273_v54 }
0x1486   :  { %3190 = vmatprep.mubr.msk.f32.mxu1 %vm3711_vm6, %v3712_v49  ;;  %v2265_v56 = vmul.f32 %v2689_v39, %v2256_v55 }
0x1488   :  { %v2274_v53 = vadd.f32 %v2690_v41, %v2265_v56 }
0x148a   :  { %3191 = vmatmul.mubr.msk.f32.gmra.mrb[54].mxu1 %vm252_vm4, %v2274_v53 }
0x1554   :  { %v2361_v4 = vpop.f32.mrb[50].mxu1 }
0x1555   :  { %v2362_v17 = vadd.f32 %v2691_v14, %v2361_v4  ;;  %v3186_v47 = vpop.f32.mrb[51].mxu1 }
0x1557   :  { %v2378_v18 = vmul.f32 0.70710677, %v2362_v17  ;;  %v2375_v28 = vmul.f32 0.5, %v2362_v17  ;;  %v2696_v17 = vld [vmem:[%s3866_s20] ss:$0 sm:$0xff]  ;;  %s3657_s20 = scalar_lea.vmem %s2567_s18, 384 }
0x1558   :  { %v2366_v44 = vpop.f32.mrb[52].mxu1  ;;  %p3658_p0 = scmp.ne.s32.totalorder %s2567_s18, %s3657_s20  ;;  %p3663_p2 = scmp.lt.s32.totalorder %s3657_s20, %s3657_s20 }
0x1559   :  { %3636 = verf.f32 %v2378_v18  ;;  %v2367_v11 = vadd.f32 %v2691_v14, %v2366_v44  ;;  %v3189_v16 = vpop.f32.mrb[53].mxu1  ;;  %v2697_v18 = vld [vmem:[%s3871_s27] ss:$0 sm:$0xff] }
0x155a   :  { %p3664_p3 = por %p3663_p2, %p3662_p1 }
0x155b   :  { %v2379_v22 = vmul.f32 0.70710677, %v2367_v11  ;;  %v2376_v20 = vmul.f32 0.5, %v2367_v11 }
0x155c   :  { %p3665_p4 = pnand %p3664_p3, %p3658_p0 }
0x155d   :  { %3638 = verf.f32 %v2379_v22  ;;  %v2371_v21 = vpop.f32.mrb[54].mxu1 }
0x155e   :  { %v2372_v23 = vadd.f32 %v2691_v14, %v2371_v21  ;;  %v3192_v24 = vpop.f32.mrb[55].mxu1 }
0x1560   :  { %v2380_v26 = vmul.f32 0.70710677, %v2372_v23  ;;  %v2377_v0 = vmul.f32 0.5, %v2372_v23 }
0x1562   :  { %3640 = verf.f32 %v2380_v26 }
0x1563   :  { %v3637_v45 = vpop.eup %3636 }
0x1564   :  { %v2384_v25 = vadd.f32 1.0, %v3637_v45 }
0x1566   :  { %v2387_v29 = vmul.f32 %v2384_v25, %v2375_v28 }
0x1567   :  { %v3639_v57 = vpop.eup %3638 }
0x1568   :  { %v2385_v32 = vadd.f32 1.0, %v3639_v57  ;;  %3226 = vmatmul.mubr.f32.vlgmr.msra.gmra.mrb[60].mxu0 %v2387_v29 }
0x1569   :  { %3228 = vmatprep.mubr.msk.f32.mxu0 %vm3711_vm6, %v3712_v49 }
0x156a   :  { %v2388_v19 = vmul.f32 %v2385_v32, %v2376_v20 }
0x156c   :  { %v3641_v33 = vpop.eup %3640  ;;  %3229 = vmatmul.mubr.f32.gmra.mrb[62].mxu0 %v2388_v19 }
0x156d   :  { %v2386_v34 = vadd.f32 1.0, %v3641_v33  ;;  %3231 = vmatprep.mubr.msk.f32.mxu0 %vm3711_vm6, %v3712_v49 }
0x156f   :  { %v2389_v62 = vmul.f32 %v2386_v34, %v2377_v0 }
0x1571   :  { %3232 = vmatmul.mubr.f32.gmra.mrb[64].mxu0 %v2389_v62 }
0x163b   :  { %v2472_v27 = vpop.f32.mrb[60].mxu0 }
0x163c   :  { %v2486_v35 = vadd.f32 %v2472_v27, %v4589_v43  ;;  %v3227_v38 = vpop.f32.mrb[61].mxu0 }
0x163e   :  { %v2496_v31 = vadd.f32 %v2695_v30, %v2486_v35 }
0x163f   :  { %v2477_v36 = vpop.f32.mrb[62].mxu0 }
0x1640   :  { %v2487_v37 = vadd.f32 %v2477_v36, %v4594_v59  ;;  %v3230_v39 = vpop.f32.mrb[63].mxu0  ;;  %v2501_v40 = vsel %vm252_vm4, %v2496_v31, 0.0 }
0x1641   :  { %2502 = vadd.xlane.f32.xlu0 %v2501_v40 }
0x1642   :  { %v2497_v41 = vadd.f32 %v2695_v30, %v2487_v37 }
0x1644   :  { %v2482_v42 = vpop.f32.mrb[64].mxu0  ;;  %v2504_v46 = vsel %vm252_vm4, %v2497_v41, 0.0 }
0x1645   :  { %v2488_v49 = vadd.f32 %v2482_v42, %v4599_v63  ;;  %2505 = vadd.xlane.f32.xlu1 %v2504_v46  ;;  %v3233_v48 = vpop.f32.mrb[65].mxu0 }
0x1647   :  { %v2498_v50 = vadd.f32 %v2695_v30, %v2488_v49 }
0x1649   :  { %v2507_v43 = vsel %vm259_vm2, %v2498_v50, 0.0 }
0x164a   :  { %2508 = vadd.xlane.f32.xlu0 %v2507_v43 }
0x16ce   :  { %v2503_v51 = vpop.xlane.xlu0 %2502 }
0x16cf   :  { %v2510_v52 = vmul.f32 0.03125, %v2503_v51 }
0x16d1   :  { %v2513_v54 = vsub.f32 %v2496_v31, %v2510_v52 }
0x16d2   :  { %v2506_v59 = vpop.xlane.xlu1 %2505 }
0x16d3   :  { %v2511_v55 = vmul.f32 0.03125, %v2506_v59  ;;  %v2516_v56 = vmul.f32 %v2513_v54, %v2513_v54 }
0x16d5   :  { %v2514_v53 = vsub.f32 %v2497_v41, %v2511_v55  ;;  %v2519_v58 = vsel %vm252_vm4, %v2516_v56, 0.0 }
0x16d6   :  { %2520 = vadd.xlane.f32.xlu1 %v2519_v58 }
0x16d7   :  { %v2509_v60 = vpop.xlane.xlu0 %2508  ;;  %v2517_v61 = vmul.f32 %v2514_v53, %v2514_v53 }
0x16d8   :  { %v2512_v1 = vmul.f32 0.03125, %v2509_v60 }
0x16d9   :  { %v2522_v63 = vsel %vm252_vm4, %v2517_v61, 0.0 }
0x16da   :  { %v2515_v2 = vsub.f32 %v2498_v50, %v2512_v1  ;;  %2523 = vadd.xlane.f32.xlu0 %v2522_v63 }
0x16dc   :  { %v2518_v3 = vmul.f32 %v2515_v2, %v2515_v2 }
0x16de   :  { %v2525_v6 = vsel %vm259_vm2, %v2518_v3, 0.0 }
0x16df   :  { %2526 = vadd.xlane.f32.xlu1 %v2525_v6 }
0x1763   :  { %v2521_v7 = vpop.xlane.xlu1 %2520 }
0x1764   :  { %v2528_v10 = vmul.f32 0.03125, %v2521_v7 }
0x1766   :  { %v2531_v5 = vadd.f32 1e-05, %v2528_v10 }
0x1767   :  { %v2524_v8 = vpop.xlane.xlu0 %2523 }
0x1768   :  { %3642 = vrsqrt.f32 %v2531_v5  ;;  %v2529_v12 = vmul.f32 0.03125, %v2524_v8 }
0x176a   :  { %v2532_v15 = vadd.f32 1e-05, %v2529_v12 }
0x176c   :  { %3644 = vrsqrt.f32 %v2532_v15  ;;  %v2527_v13 = vpop.xlane.xlu1 %2526 }
0x176d   :  { %v2530_v9 = vmul.f32 0.03125, %v2527_v13 }
0x176f   :  { %v2533_v14 = vadd.f32 1e-05, %v2530_v9 }
0x1771   :  { %3646 = vrsqrt.f32 %v2533_v14 }
0x1772   :  { %v3643_v4 = vpop.eup %3642 }
0x1773   :  { %v2537_v47 = vmul.f32 %v3643_v4, %v2513_v54 }
0x1775   :  { %v2546_v44 = vmul.f32 %v2696_v17, %v2537_v47 }
0x1776   :  { %v3645_v11 = vpop.eup %3644 }
0x1777   :  { %v2538_v16 = vmul.f32 %v3645_v11, %v2514_v53  ;;  %v2555_v22 = vadd.f32 %v2697_v18, %v2546_v44 }
0x1779   :  { %v2547_v21 = vmul.f32 %v2696_v17, %v2538_v16  ;;  %2558 = vst.msk [vmem:[#allocation2] sm:$0xff] %vm252_vm4, %v2555_v22 }
0x177b   :  { %v3647_v23 = vpop.eup %3646  ;;  %v2556_v24 = vadd.f32 %v2697_v18, %v2547_v21 }
0x177c   :  { %v2539_v26 = vmul.f32 %v3647_v23, %v2515_v2 }
0x177d   :  { %2559 = vst.msk [vmem:[#allocation2 + $0x8] sm:$0xff] %vm252_vm4, %v2556_v24 }
0x177e   :  { %v2548_v45 = vmul.f32 %v2696_v17, %v2539_v26 }
0x1780   :  { %v2557_v28 = vadd.f32 %v2697_v18, %v2548_v45 }
0x1782   :  { %2560 = vst.msk [vmem:[#allocation2 + $0x10] sm:$0x3] %vm259_vm2, %v2557_v28 }
0x1783   :  { %3668 = shalt.err (!%p3665_p4)
}
0x1784   :  { %s3669_s27 = scalar_lea.hbm %s3876_s4, 384 }
0x1785   :  { %p3670_p5 = scmp.ne.s32.totalorder %s3876_s4, %s3669_s27  ;;  %p3673_p6 = scmp.lt.u32.totalorder %s3669_s27, %s3876_s4 }
0x1787   :  { %p3675_p7 = pnand %p3673_p6, %p3670_p5 }
0x1789   :  { %3678 = shalt.err (!%p3675_p7)
}
0x178a   :  { %s3722_s22 = smov 128  }
0x178b   :  { %2572 = dma.vmem_to_hbm [thread:$0]  %s2567_s18, 384, %s3876_s4, [#allocation3], %s3722_s22, %s3722_s22, %s3718_s25  }
0x178c   :  { %3679 = dma.done.wait [#allocation3], 384  }
0x178d   :  { %3680 = vsyncadd [#allocation3], 4294966912 }
0x178e   :  { %2576 = vsyncpa [#allocation3], 1 }

</bundles_post_ra>
